<compile_context>
chip_gen: v7x
topology: tpu7x:2x2x1
jax: 0.10.0
libtpu: 0.0.40
codegen_flags: <defaults>
</compile_context>

<pallas_src>
import jax
import jax.numpy as jnp
from jax.experimental import pallas as pl
from jax.experimental.pallas import tpu as pltpu


def _leaky_relu(x, slope=0.2):
    return jnp.where(x > 0, x, slope * x)


def _round_up(x, m):
    return ((x + m - 1) // m) * m


def _device_kind():
    try:
        return jax.devices()[0].device_kind.lower()
    except Exception:
        return ""


def _vmem_capacity_bytes():
    """Physical VMEM per core, from the chip when possible."""
    try:
        info = pltpu.get_tpu_info()
        cap = getattr(info, "vmem_capacity_bytes", None)
        if cap:
            return int(cap)
    except Exception:
        pass
    kind = _device_kind()
    return (64 if "v7" in kind else 128) * 2**20


def _is_v5e():
    kind = _device_kind()
    return ("v5e" in kind) or ("v5 lite" in kind) or ("v5lite" in kind)


def _choose_batch_tile(batch):
    """MXU-dense batch tiles; >= 2 grid steps for mid/large batches (megacore)."""
    if batch >= 512:
        return 256                                     # dense M=256 tiles, grid >= 2
    if batch > 256:
        return _round_up(pl.cdiv(batch, 2), 128)       # 2 balanced MXU-dense tiles
    if batch >= 32:
        return max(16, _round_up(pl.cdiv(batch, 2), 8))  # 2 tiles so v7x core 1 works
    return max(16, _round_up(batch, 8))                # tiny batch: one small tile


def make_vae_kernel(n_enc_layers, n_dec_layers, latent_dim, lat2_pad, act_dtype):
    """Fused kernel: encoder MLP -> reparameterize (lane-dense) -> decoder MLP.

    Kernel args: x_ref, eps_ref, <2*(n_enc+n_dec) param refs>, decoded_ref, enc_ref.
    """
    n_params = 2 * (n_enc_layers + n_dec_layers)
    roll_shift = lat2_pad - latent_dim  # np.roll semantics: result[0:L] = x[L:2L]

    def _linear(h, w_ref, b_ref):
        # Cast activation to the weight dtype (bf16 for big layers, f32 for the
        # tiny latent-adjacent layers); accumulate in f32; f32 bias add.
        acc = jnp.dot(h.astype(w_ref.dtype), w_ref[...],
                      preferred_element_type=jnp.float32)
        return acc + b_ref[...]

    def kernel(x_ref, eps_ref, *refs):
        param_refs = refs[:n_params]
        decoded_ref, enc_ref = refs[n_params:]

        h = x_ref[...]
        idx = 0

        # ---- Encoder: Linear + LeakyReLU(0.2) per hidden layer, last Linear no act.
        for i in range(n_enc_layers):
            h = _linear(h, param_refs[idx], param_refs[idx + 1])
            idx += 2
            if i < n_enc_layers - 1:
                h = _leaky_relu(h.astype(act_dtype))

        # h: (TB, lat2_pad) f32.  Cols [0:L] = mu, [L:2L] = log_var, rest exact 0
        # (zero-padded final encoder weight/bias).  Single lane-dense store.
        enc_ref[...] = h

        # ---- reparameterize (lane-dense): align log_var under mu with an XLU
        # roll, mask lanes >= L so padded lanes can never produce inf*0, then
        # z = mu + eps * exp(0.5 * log_var) on a full (TB, lat2_pad) vreg slab.
        lv_rolled = pltpu.roll(h, shift=roll_shift, axis=1)
        lane = jax.lax.broadcasted_iota(jnp.int32, h.shape, 1)
        lv_full = jnp.where(lane < latent_dim, lv_rolled, 0.0)
        z = h + eps_ref[...] * jnp.exp(0.5 * lv_full)
        # Lanes [0:L] of z hold mu + eps*std; the junk lanes (log_var / zeros)
        # hit the zero rows of the padded first decoder weight.

        # ---- Decoder: Linear + LeakyReLU(0.2) per hidden layer, final Linear+Sigmoid.
        h = z
        for i in range(n_dec_layers):
            h = _linear(h, param_refs[idx], param_refs[idx + 1])
            idx += 2
            if i < n_dec_layers - 1:
                h = _leaky_relu(h.astype(act_dtype))
            else:
                h = jax.nn.sigmoid(h)

        decoded_ref[...] = h.astype(decoded_ref.dtype)

    return kernel


def linear_vae_forward(x, eps, enc_params, dec_params, latent_dim,
                       param_dtype=jnp.bfloat16, batch_tile=None,
                       decoded_dtype=jnp.float32):
    """x: (B, C, H, W) f32 NCHW.  eps: (B, latent_dim) ~ N(0,1).
    Returns (decoded NCHW, mu, log_var)."""
    B, C, H, W = x.shape
    D_in = C * H * W
    x_flat = x.reshape(B, D_in).astype(jnp.float32)
    eps = eps.astype(jnp.float32)

    D_out = dec_params[-1][0].shape[1]
    lat2 = 2 * latent_dim
    lat2_pad = _round_up(lat2, 128)  # lane-dense latent width

    enc_params = [tuple(p) for p in enc_params]
    dec_params = [tuple(p) for p in dec_params]

    # Zero-pad final encoder layer to lat2_pad output cols (lane-dense [mu|lv|0]).
    w_le, b_le = enc_params[-1]
    pad_cols = lat2_pad - lat2
    if pad_cols:
        w_le = jnp.pad(w_le, ((0, 0), (0, pad_cols)))
        b_le = jnp.pad(b_le, ((0, 0), (0, pad_cols)))
    enc_params[-1] = (w_le, b_le)

    # Zero-pad first decoder layer input rows latent_dim -> lat2_pad: the junk
    # z lanes hit zero weight rows and contribute nothing.
    w_d0, b_d0 = dec_params[0]
    pad_rows = lat2_pad - latent_dim
    if pad_rows:
        w_d0 = jnp.pad(w_d0, ((0, pad_rows), (0, 0)))
    dec_params[0] = (w_d0, b_d0)

    # eps padded to lat2_pad lanes (values in [0:latent_dim], zeros elsewhere).
    eps = jnp.pad(eps, ((0, 0), (0, lat2_pad - latent_dim)))

    n_enc, n_dec = len(enc_params), len(dec_params)

    # Param dtypes: big hidden weights in bf16 (halves the dominant weight DMA);
    # the tiny final-encoder / first-decoder weights and all biases stay f32.
    flat_params = []
    for li, (w, b) in enumerate(enc_params + dec_params):
        keep_f32 = (li == n_enc - 1) or (li == n_enc)
        flat_params.append(w.astype(jnp.float32 if keep_f32 else param_dtype))
        flat_params.append(b.astype(jnp.float32))

    # Hidden activations bf16 on v6e/v7x; f32 on v5e (no bf16 VPU there).
    act_dtype = jnp.float32 if _is_v5e() else jnp.bfloat16

    # Batch tiling (MXU-dense, megacore-aware); pad B to a multiple of TB.
    TB = batch_tile if batch_tile is not None else _choose_batch_tile(B)
    TB = max(8, _round_up(TB, 8))
    B_pad = _round_up(B, TB)
    if B_pad != B:
        x_flat = jnp.pad(x_flat, ((0, B_pad - B), (0, 0)))
        eps = jnp.pad(eps, ((0, B_pad - B), (0, 0)))
    grid = (B_pad // TB,)

    kernel = make_vae_kernel(n_enc, n_dec, latent_dim, lat2_pad, act_dtype)

    in_specs = [
        pl.BlockSpec((TB, D_in), lambda i: (i, 0)),        # x tile
        pl.BlockSpec((TB, lat2_pad), lambda i: (i, 0)),     # eps tile (lane-dense)
    ]
    # Weights / biases: full-shape blocks, constant block index, SINGLE-buffered
    # (Buffered(1)) -> fetched once, VMEM-resident, no re-prefetch buffer waste.
    for p in flat_params:
        in_specs.append(pl.BlockSpec(p.shape, lambda i: (0, 0),
                                     pipeline_mode=pl.Buffered(1)))

    out_specs = (
        pl.BlockSpec((TB, D_out), lambda i: (i, 0)),        # decoded tile
        pl.BlockSpec((TB, lat2_pad), lambda i: (i, 0)),     # [mu | logvar | 0] tile
    )

    # Cost estimate (advisory for XLA scheduling around the custom call).
    layer_dims = [(w.shape[0], w.shape[1]) for w, _ in enc_params + dec_params]
    flops = 2 * B_pad * sum(m * n for m, n in layer_dims)
    transcendentals = B_pad * (latent_dim + D_out)  # exp in reparam + sigmoid
    param_bytes = sum(int(p.size) * p.dtype.itemsize for p in flat_params)
    dec_itemsize = jnp.dtype(decoded_dtype).itemsize
    act_bytes = (4 * (x_flat.size + eps.size + B_pad * lat2_pad)
                 + dec_itemsize * B_pad * D_out)
    cost = pl.CostEstimate(flops=flops, transcendentals=transcendentals,
                           bytes_accessed=param_bytes + int(act_bytes))

    # VMEM budget: single-buffered resident params + double-buffered tile I/O,
    # clamped to ~85% of this chip's physical VMEM (64 MiB v7x / 128 MiB v5e,v6e).
    tile_io_bytes = TB * (4 * D_in + 4 * lat2_pad + 4 * lat2_pad
                          + dec_itemsize * D_out)
    vmem_needed = param_bytes + 2 * tile_io_bytes
    vmem_cap = int(0.85 * _vmem_capacity_bytes())
    vmem_limit = int(min(vmem_cap, max(2 * vmem_needed, 32 * 2**20)))

    decoded_flat, enc_out = pl.pallas_call(
        kernel,
        out_shape=(
            jax.ShapeDtypeStruct((B_pad, D_out), decoded_dtype),
            jax.ShapeDtypeStruct((B_pad, lat2_pad), jnp.float32),
        ),
        grid=grid,
        in_specs=in_specs,
        out_specs=out_specs,
        compiler_params=pltpu.CompilerParams(
            dimension_semantics=("parallel",),   # megacore sharding on v7x
            vmem_limit_bytes=vmem_limit,
        ),
        cost_estimate=cost,
    )(x_flat, eps, *flat_params)

    decoded = decoded_flat[:B].reshape(B, C, H, W)
    mu = enc_out[:B, :latent_dim]
    log_var = enc_out[:B, latent_dim:lat2]
    return decoded, mu, log_var


# ----------------------------------------------------------------------------
# Pure-JAX f32 reference (mirrors the PyTorch module) for validation.
# ----------------------------------------------------------------------------
def linear_vae_reference(x, eps, enc_params, dec_params, latent_dim):
    B = x.shape[0]
    h = x.reshape(B, -1)
    for i, (w, b) in enumerate(enc_params):
        h = h @ w + b
        if i < len(enc_params) - 1:
            h = _leaky_relu(h)
    mu, log_var = h[:, :latent_dim], h[:, latent_dim:]
    z = mu + eps * jnp.exp(0.5 * log_var)
    h = z
    for i, (w, b) in enumerate(dec_params):
        h = h @ w + b
        if i < len(dec_params) - 1:
            h = _leaky_relu(h)
        else:
            h = jax.nn.sigmoid(h)
    return h.reshape(x.shape), mu, log_var


def init_linear(key, in_dim, out_dim):
    """PyTorch-style uniform(-1/sqrt(in), 1/sqrt(in)) init."""
    kw, kb = jax.random.split(key)
    bound = 1.0 / float(in_dim) ** 0.5
    w = jax.random.uniform(kw, (in_dim, out_dim), jnp.float32, -bound, bound)
    b = jax.random.uniform(kb, (1, out_dim), jnp.float32, -bound, bound)
    return w, b


def build_params(key, input_dim, latent_dim, hidden_dims, output_dim):
    enc_dims = [input_dim] + list(hidden_dims) + [2 * latent_dim]
    dec_dims = [latent_dim] + list(reversed(hidden_dims)) + [output_dim]
    enc_params, dec_params = [], []
    for i in range(len(enc_dims) - 1):
        key, sub = jax.random.split(key)
        enc_params.append(init_linear(sub, enc_dims[i], enc_dims[i + 1]))
    for i in range(len(dec_dims) - 1):
        key, sub = jax.random.split(key)
        dec_params.append(init_linear(sub, dec_dims[i], dec_dims[i + 1]))
    return enc_params, dec_params


if __name__ == "__main__":
    key = jax.random.PRNGKey(0)

    B, C, H, W = 2, 4, 16, 16
    input_dim = C * H * W          # 1024
    output_dim = input_dim
    latent_dim = 32
    hidden_dims = [256, 128]

    k_params, k_x, k_eps = jax.random.split(key, 3)
    enc_params, dec_params = build_params(k_params, input_dim, latent_dim,
                                          hidden_dims, output_dim)

    x = jax.random.normal(k_x, (B, C, H, W), jnp.float32)
    eps = jax.random.normal(k_eps, (B, latent_dim), jnp.float32)

    decoded, mu, log_var = linear_vae_forward(x, eps, enc_params, dec_params,
                                              latent_dim)
    decoded = jax.block_until_ready(decoded)
    mu = jax.block_until_ready(mu)
    log_var = jax.block_until_ready(log_var)

    assert decoded.shape == (B, C, H, W)
    assert mu.shape == (B, latent_dim)
    assert log_var.shape == (B, latent_dim)
    assert bool(jnp.all((decoded >= 0.0) & (decoded <= 1.0)))  # sigmoid range

    # Validate against the f32 reference.  Tolerance covers the bf16 hidden
    # weights/activations; the latent-adjacent layers stay f32 so mu/log_var
    # are near-f32 accurate.
    dec_ref, mu_ref, lv_ref = linear_vae_reference(x, eps, enc_params, dec_params,
                                                   latent_dim)
    assert bool(jnp.allclose(decoded, dec_ref, atol=5e-2))
    assert bool(jnp.allclose(mu, mu_ref, atol=5e-2))
    assert bool(jnp.allclose(log_var, lv_ref, atol=5e-2))

    print("KERNEL_OK")
</pallas_src>

<mosaic_0001>
module attributes {stable_mosaic.version = 11 : i64} {
  func.func @kernel(%arg0: i32, %arg1: memref<16x1024xf32, #tpu.memory_space<vmem>>, %arg2: memref<16x128xf32, #tpu.memory_space<vmem>>, %arg3: memref<1024x256xbf16, #tpu.memory_space<vmem>>, %arg4: memref<1x256xf32, #tpu.memory_space<vmem>>, %arg5: memref<256x128xbf16, #tpu.memory_space<vmem>>, %arg6: memref<1x128xf32, #tpu.memory_space<vmem>>, %arg7: memref<128x128xf32, #tpu.memory_space<vmem>>, %arg8: memref<1x128xf32, #tpu.memory_space<vmem>>, %arg9: memref<128x128xf32, #tpu.memory_space<vmem>>, %arg10: memref<1x128xf32, #tpu.memory_space<vmem>>, %arg11: memref<128x256xbf16, #tpu.memory_space<vmem>>, %arg12: memref<1x256xf32, #tpu.memory_space<vmem>>, %arg13: memref<256x1024xbf16, #tpu.memory_space<vmem>>, %arg14: memref<1x1024xf32, #tpu.memory_space<vmem>>, %arg15: memref<16x1024xf32, #tpu.memory_space<vmem>>, %arg16: memref<16x128xf32, #tpu.memory_space<vmem>>) attributes {dimension_semantics = [#tpu.dimension_semantics<parallel>], iteration_bounds = array<i64: 1>, scalar_prefetch = 0 : i64, scratch_operands = 0 : i64, tpu.core_type = #tpu.core_type<tc>, window_params = [{transform_indices = @transform_0, window_bounds = array<i64: 16, 1024>}, {transform_indices = @transform_1, window_bounds = array<i64: 16, 128>}, {pipeline_mode = #tpu.pipeline_mode<synchronous>, transform_indices = @transform_2, window_bounds = array<i64: 1024, 256>}, {pipeline_mode = #tpu.pipeline_mode<synchronous>, transform_indices = @transform_3, window_bounds = array<i64: 1, 256>}, {pipeline_mode = #tpu.pipeline_mode<synchronous>, transform_indices = @transform_4, window_bounds = array<i64: 256, 128>}, {pipeline_mode = #tpu.pipeline_mode<synchronous>, transform_indices = @transform_5, window_bounds = array<i64: 1, 128>}, {pipeline_mode = #tpu.pipeline_mode<synchronous>, transform_indices = @transform_6, window_bounds = array<i64: 128, 128>}, {pipeline_mode = #tpu.pipeline_mode<synchronous>, transform_indices = @transform_7, window_bounds = array<i64: 1, 128>}, {pipeline_mode = #tpu.pipeline_mode<synchronous>, transform_indices = @transform_8, window_bounds = array<i64: 128, 128>}, {pipeline_mode = #tpu.pipeline_mode<synchronous>, transform_indices = @transform_9, window_bounds = array<i64: 1, 128>}, {pipeline_mode = #tpu.pipeline_mode<synchronous>, transform_indices = @transform_10, window_bounds = array<i64: 128, 256>}, {pipeline_mode = #tpu.pipeline_mode<synchronous>, transform_indices = @transform_11, window_bounds = array<i64: 1, 256>}, {pipeline_mode = #tpu.pipeline_mode<synchronous>, transform_indices = @transform_12, window_bounds = array<i64: 256, 1024>}, {pipeline_mode = #tpu.pipeline_mode<synchronous>, transform_indices = @transform_13, window_bounds = array<i64: 1, 1024>}, {transform_indices = @transform_14, window_bounds = array<i64: 16, 1024>}, {transform_indices = @transform_15, window_bounds = array<i64: 16, 128>}]} {
    %c0 = arith.constant 0 : index
    %c0_0 = arith.constant 0 : index
    %0 = vector.load %arg1[%c0, %c0_0] : memref<16x1024xf32, #tpu.memory_space<vmem>>, vector<16x1024xf32>
    %1 = arith.truncf %0 : vector<16x1024xf32> to vector<16x1024xbf16>
    %c0_1 = arith.constant 0 : index
    %c0_2 = arith.constant 0 : index
    %2 = vector.load %arg3[%c0_1, %c0_2] : memref<1024x256xbf16, #tpu.memory_space<vmem>>, vector<1024x256xbf16>
    %cst = arith.constant dense<0.000000e+00> : vector<16x256xf32>
    %3 = tpu.matmul %1, %2, %cst {dimension_numbers = #tpu.dot_dimension_numbers<[1], [0], [0], [1], [0, 0, 1, 1], [], []>} : vector<16x1024xbf16>, vector<1024x256xbf16>, vector<16x256xf32> -> vector<16x256xf32>
    %c0_3 = arith.constant 0 : index
    %c0_4 = arith.constant 0 : index
    %4 = vector.load %arg4[%c0_3, %c0_4] : memref<1x256xf32, #tpu.memory_space<vmem>>, vector<1x256xf32>
    %5 = vector.broadcast %4 : vector<1x256xf32> to vector<16x256xf32>
    %6 = arith.addf %3, %5 : vector<16x256xf32>
    %7 = arith.truncf %6 : vector<16x256xf32> to vector<16x256xbf16>
    %cst_5 = arith.constant 0.000000e+00 : bf16
    %8 = vector.broadcast %cst_5 : bf16 to vector<16x256xbf16>
    %9 = arith.cmpf ogt, %7, %8 : vector<16x256xbf16>
    %cst_6 = arith.constant 2.001950e-01 : bf16
    %10 = vector.broadcast %cst_6 : bf16 to vector<16x256xbf16>
    %11 = arith.mulf %10, %7 : vector<16x256xbf16>
    %12 = arith.select %9, %7, %11 : vector<16x256xi1>, vector<16x256xbf16>
    %c0_7 = arith.constant 0 : index
    %c0_8 = arith.constant 0 : index
    %13 = vector.load %arg5[%c0_7, %c0_8] : memref<256x128xbf16, #tpu.memory_space<vmem>>, vector<256x128xbf16>
    %cst_9 = arith.constant dense<0.000000e+00> : vector<16x128xf32>
    %14 = tpu.matmul %12, %13, %cst_9 {dimension_numbers = #tpu.dot_dimension_numbers<[1], [0], [0], [1], [0, 0, 1, 1], [], []>} : vector<16x256xbf16>, vector<256x128xbf16>, vector<16x128xf32> -> vector<16x128xf32>
    %c0_10 = arith.constant 0 : index
    %c0_11 = arith.constant 0 : index
    %15 = vector.load %arg6[%c0_10, %c0_11] : memref<1x128xf32, #tpu.memory_space<vmem>>, vector<1x128xf32>
    %16 = vector.broadcast %15 : vector<1x128xf32> to vector<16x128xf32>
    %17 = arith.addf %14, %16 : vector<16x128xf32>
    %18 = arith.truncf %17 : vector<16x128xf32> to vector<16x128xbf16>
    %cst_12 = arith.constant 0.000000e+00 : bf16
    %19 = vector.broadcast %cst_12 : bf16 to vector<16x128xbf16>
    %20 = arith.cmpf ogt, %18, %19 : vector<16x128xbf16>
    %cst_13 = arith.constant 2.001950e-01 : bf16
    %21 = vector.broadcast %cst_13 : bf16 to vector<16x128xbf16>
    %22 = arith.mulf %21, %18 : vector<16x128xbf16>
    %23 = arith.select %20, %18, %22 : vector<16x128xi1>, vector<16x128xbf16>
    %24 = arith.extf %23 : vector<16x128xbf16> to vector<16x128xf32>
    %c0_14 = arith.constant 0 : index
    %c0_15 = arith.constant 0 : index
    %25 = vector.load %arg7[%c0_14, %c0_15] : memref<128x128xf32, #tpu.memory_space<vmem>>, vector<128x128xf32>
    %cst_16 = arith.constant dense<0.000000e+00> : vector<16x128xf32>
    %26 = tpu.matmul %24, %25, %cst_16 {dimension_numbers = #tpu.dot_dimension_numbers<[1], [0], [0], [1], [0, 0, 1, 1], [], []>} : vector<16x128xf32>, vector<128x128xf32>, vector<16x128xf32> -> vector<16x128xf32>
    %c0_17 = arith.constant 0 : index
    %c0_18 = arith.constant 0 : index
    %27 = vector.load %arg8[%c0_17, %c0_18] : memref<1x128xf32, #tpu.memory_space<vmem>>, vector<1x128xf32>
    %28 = vector.broadcast %27 : vector<1x128xf32> to vector<16x128xf32>
    %29 = arith.addf %26, %28 : vector<16x128xf32>
    %c0_19 = arith.constant 0 : index
    %c0_20 = arith.constant 0 : index
    %30 = vector.load %arg16[%c0_19, %c0_20] : memref<16x128xf32, #tpu.memory_space<vmem>>, vector<16x128xf32>
    tpu.vector_store %arg16[%c0_19, %c0_20], %29 {strides = array<i32>} : memref<16x128xf32, #tpu.memory_space<vmem>>, vector<16x128xf32>,
    %c96_i32 = arith.constant 96 : i32
    %31 = tpu.dynamic_rotate %29 by %c96_i32 dim 1 : vector<16x128xf32>, i32 -> vector<16x128xf32>
    %32 = tpu.iota {dimensions = array<i32: 1>} : vector<16x128xi32>
    %c32_i32 = arith.constant 32 : i32
    %33 = vector.broadcast %c32_i32 : i32 to vector<16x128xi32>
    %34 = arith.cmpi slt, %32, %33 : vector<16x128xi32>
    %cst_21 = arith.constant 0.000000e+00 : f32
    %35 = vector.broadcast %cst_21 : f32 to vector<16x128xf32>
    %36 = arith.select %34, %31, %35 : vector<16x128xi1>, vector<16x128xf32>
    %c0_22 = arith.constant 0 : index
    %c0_23 = arith.constant 0 : index
    %37 = vector.load %arg2[%c0_22, %c0_23] : memref<16x128xf32, #tpu.memory_space<vmem>>, vector<16x128xf32>
    %cst_24 = arith.constant 5.000000e-01 : f32
    %38 = vector.broadcast %cst_24 : f32 to vector<16x128xf32>
    %39 = arith.mulf %38, %36 : vector<16x128xf32>
    %40 = math.exp %39 : vector<16x128xf32>
    %41 = arith.mulf %37, %40 : vector<16x128xf32>
    %42 = arith.addf %29, %41 : vector<16x128xf32>
    %c0_25 = arith.constant 0 : index
    %c0_26 = arith.constant 0 : index
    %43 = vector.load %arg9[%c0_25, %c0_26] : memref<128x128xf32, #tpu.memory_space<vmem>>, vector<128x128xf32>
    %cst_27 = arith.constant dense<0.000000e+00> : vector<16x128xf32>
    %44 = tpu.matmul %42, %43, %cst_27 {dimension_numbers = #tpu.dot_dimension_numbers<[1], [0], [0], [1], [0, 0, 1, 1], [], []>} : vector<16x128xf32>, vector<128x128xf32>, vector<16x128xf32> -> vector<16x128xf32>
    %c0_28 = arith.constant 0 : index
    %c0_29 = arith.constant 0 : index
    %45 = vector.load %arg10[%c0_28, %c0_29] : memref<1x128xf32, #tpu.memory_space<vmem>>, vector<1x128xf32>
    %46 = vector.broadcast %45 : vector<1x128xf32> to vector<16x128xf32>
    %47 = arith.addf %44, %46 : vector<16x128xf32>
    %48 = arith.truncf %47 : vector<16x128xf32> to vector<16x128xbf16>
    %cst_30 = arith.constant 0.000000e+00 : bf16
    %49 = vector.broadcast %cst_30 : bf16 to vector<16x128xbf16>
    %50 = arith.cmpf ogt, %48, %49 : vector<16x128xbf16>
    %cst_31 = arith.constant 2.001950e-01 : bf16
    %51 = vector.broadcast %cst_31 : bf16 to vector<16x128xbf16>
    %52 = arith.mulf %51, %48 : vector<16x128xbf16>
    %53 = arith.select %50, %48, %52 : vector<16x128xi1>, vector<16x128xbf16>
    %c0_32 = arith.constant 0 : index
    %c0_33 = arith.constant 0 : index
    %54 = vector.load %arg11[%c0_32, %c0_33] : memref<128x256xbf16, #tpu.memory_space<vmem>>, vector<128x256xbf16>
    %cst_34 = arith.constant dense<0.000000e+00> : vector<16x256xf32>
    %55 = tpu.matmul %53, %54, %cst_34 {dimension_numbers = #tpu.dot_dimension_numbers<[1], [0], [0], [1], [0, 0, 1, 1], [], []>} : vector<16x128xbf16>, vector<128x256xbf16>, vector<16x256xf32> -> vector<16x256xf32>
    %c0_35 = arith.constant 0 : index
    %c0_36 = arith.constant 0 : index
    %56 = vector.load %arg12[%c0_35, %c0_36] : memref<1x256xf32, #tpu.memory_space<vmem>>, vector<1x256xf32>
    %57 = vector.broadcast %56 : vector<1x256xf32> to vector<16x256xf32>
    %58 = arith.addf %55, %57 : vector<16x256xf32>
    %59 = arith.truncf %58 : vector<16x256xf32> to vector<16x256xbf16>
    %cst_37 = arith.constant 0.000000e+00 : bf16
    %60 = vector.broadcast %cst_37 : bf16 to vector<16x256xbf16>
    %61 = arith.cmpf ogt, %59, %60 : vector<16x256xbf16>
    %cst_38 = arith.constant 2.001950e-01 : bf16
    %62 = vector.broadcast %cst_38 : bf16 to vector<16x256xbf16>
    %63 = arith.mulf %62, %59 : vector<16x256xbf16>
    %64 = arith.select %61, %59, %63 : vector<16x256xi1>, vector<16x256xbf16>
    %c0_39 = arith.constant 0 : index
    %c0_40 = arith.constant 0 : index
    %65 = vector.load %arg13[%c0_39, %c0_40] : memref<256x1024xbf16, #tpu.memory_space<vmem>>, vector<256x1024xbf16>
    %cst_41 = arith.constant dense<0.000000e+00> : vector<16x1024xf32>
    %66 = tpu.matmul %64, %65, %cst_41 {dimension_numbers = #tpu.dot_dimension_numbers<[1], [0], [0], [1], [0, 0, 1, 1], [], []>} : vector<16x256xbf16>, vector<256x1024xbf16>, vector<16x1024xf32> -> vector<16x1024xf32>
    %c0_42 = arith.constant 0 : index
    %c0_43 = arith.constant 0 : index
    %67 = vector.load %arg14[%c0_42, %c0_43] : memref<1x1024xf32, #tpu.memory_space<vmem>>, vector<1x1024xf32>
    %68 = vector.broadcast %67 : vector<1x1024xf32> to vector<16x1024xf32>
    %69 = arith.addf %66, %68 : vector<16x1024xf32>
    %70 = arith.negf %69 : vector<16x1024xf32>
    %71 = math.exp %70 : vector<16x1024xf32>
    %cst_44 = arith.constant 1.000000e+00 : f32
    %72 = vector.broadcast %cst_44 : f32 to vector<16x1024xf32>
    %73 = arith.addf %72, %71 : vector<16x1024xf32>
    %74 = arith.divf %72, %73 : vector<16x1024xf32>
    %c0_45 = arith.constant 0 : index
    %c0_46 = arith.constant 0 : index
    %75 = vector.load %arg15[%c0_45, %c0_46] : memref<16x1024xf32, #tpu.memory_space<vmem>>, vector<16x1024xf32>
    tpu.vector_store %arg15[%c0_45, %c0_46], %74 {strides = array<i32>} : memref<16x1024xf32, #tpu.memory_space<vmem>>, vector<16x1024xf32>,
    return
  }
  func.func @transform_0(%arg0: i32) -> (i32, i32) {
    %c0_i32 = arith.constant 0 : i32
    %c0_i32_0 = arith.constant 0 : i32
    return %arg0, %c0_i32 : i32, i32
  }
  func.func @transform_1(%arg0: i32) -> (i32, i32) {
    %c0_i32 = arith.constant 0 : i32
    %c0_i32_0 = arith.constant 0 : i32
    return %arg0, %c0_i32 : i32, i32
  }
  func.func @transform_2(%arg0: i32) -> (i32, i32) {
    %c0_i32 = arith.constant 0 : i32
    %c0_i32_0 = arith.constant 0 : i32
    %c0_i32_1 = arith.constant 0 : i32
    return %c0_i32, %c0_i32_0 : i32, i32
  }
  func.func @transform_3(%arg0: i32) -> (i32, i32) {
    %c0_i32 = arith.constant 0 : i32
    %c0_i32_0 = arith.constant 0 : i32
    %c0_i32_1 = arith.constant 0 : i32
    return %c0_i32, %c0_i32_0 : i32, i32
  }
  func.func @transform_4(%arg0: i32) -> (i32, i32) {
    %c0_i32 = arith.constant 0 : i32
    %c0_i32_0 = arith.constant 0 : i32
    %c0_i32_1 = arith.constant 0 : i32
    return %c0_i32, %c0_i32_0 : i32, i32
  }
  func.func @transform_5(%arg0: i32) -> (i32, i32) {
    %c0_i32 = arith.constant 0 : i32
    %c0_i32_0 = arith.constant 0 : i32
    %c0_i32_1 = arith.constant 0 : i32
    return %c0_i32, %c0_i32_0 : i32, i32
  }
  func.func @transform_6(%arg0: i32) -> (i32, i32) {
    %c0_i32 = arith.constant 0 : i32
    %c0_i32_0 = arith.constant 0 : i32
    %c0_i32_1 = arith.constant 0 : i32
    return %c0_i32, %c0_i32_0 : i32, i32
  }
  func.func @transform_7(%arg0: i32) -> (i32, i32) {
    %c0_i32 = arith.constant 0 : i32
    %c0_i32_0 = arith.constant 0 : i32
    %c0_i32_1 = arith.constant 0 : i32
    return %c0_i32, %c0_i32_0 : i32, i32
  }
  func.func @transform_8(%arg0: i32) -> (i32, i32) {
    %c0_i32 = arith.constant 0 : i32
    %c0_i32_0 = arith.constant 0 : i32
    %c0_i32_1 = arith.constant 0 : i32
    return %c0_i32, %c0_i32_0 : i32, i32
  }
  func.func @transform_9(%arg0: i32) -> (i32, i32) {
    %c0_i32 = arith.constant 0 : i32
    %c0_i32_0 = arith.constant 0 : i32
    %c0_i32_1 = arith.constant 0 : i32
    return %c0_i32, %c0_i32_0 : i32, i32
  }
  func.func @transform_10(%arg0: i32) -> (i32, i32) {
    %c0_i32 = arith.constant 0 : i32
    %c0_i32_0 = arith.constant 0 : i32
    %c0_i32_1 = arith.constant 0 : i32
    return %c0_i32, %c0_i32_0 : i32, i32
  }
  func.func @transform_11(%arg0: i32) -> (i32, i32) {
    %c0_i32 = arith.constant 0 : i32
    %c0_i32_0 = arith.constant 0 : i32
    %c0_i32_1 = arith.constant 0 : i32
    return %c0_i32, %c0_i32_0 : i32, i32
  }
  func.func @transform_12(%arg0: i32) -> (i32, i32) {
    %c0_i32 = arith.constant 0 : i32
    %c0_i32_0 = arith.constant 0 : i32
    %c0_i32_1 = arith.constant 0 : i32
    return %c0_i32, %c0_i32_0 : i32, i32
  }
  func.func @transform_13(%arg0: i32) -> (i32, i32) {
    %c0_i32 = arith.constant 0 : i32
    %c0_i32_0 = arith.constant 0 : i32
    %c0_i32_1 = arith.constant 0 : i32
    return %c0_i32, %c0_i32_0 : i32, i32
  }
  func.func @transform_14(%arg0: i32) -> (i32, i32) {
    %c0_i32 = arith.constant 0 : i32
    %c0_i32_0 = arith.constant 0 : i32
    return %arg0, %c0_i32 : i32, i32
  }
  func.func @transform_15(%arg0: i32) -> (i32, i32) {
    %c0_i32 = arith.constant 0 : i32
    %c0_i32_0 = arith.constant 0 : i32
    return %arg0, %c0_i32 : i32, i32
  }
}

</mosaic_0001>

<bundles_post_ra>
// kernel: tpu_custom_call.1
= control target key start
LH: loop header
LB: loop body
LE: loop exit
PB: predicated region body
PF: predicated region fallthrough
CT: control target
= control target key end

     0   :  { %s4227_s0 = inlined_call_operand.hbm [shape: f32[16,1024], index: 0, kind: input, shape index: {}]   ;;  %s4228_s1 = inlined_call_operand.hbm [shape: f32[16,128], index: 1, kind: input, shape index: {}]   ;;  %s4229_s2 = inlined_call_operand.hbm [shape: bf16[1024,256], index: 2, kind: input, shape index: {}]   ;;  %s4230_s3 = inlined_call_operand.vmem [shape: f32[1,256], index: 3, kind: input, shape index: {}]   ;;  %s4231_s4 = inlined_call_operand.hbm [shape: bf16[256,128], index: 4, kind: input, shape index: {}]   ;;  %s4232_s5 = inlined_call_operand.vmem [shape: f32[1,128], index: 5, kind: input, shape index: {}]   ;;  %s4233_s6 = inlined_call_operand.hbm [shape: f32[128,128], index: 6, kind: input, shape index: {}]   ;;  %s4234_s7 = inlined_call_operand.vmem [shape: f32[1,128], index: 7, kind: input, shape index: {}]   ;;  %s4235_s8 = inlined_call_operand.hbm [shape: f32[128,128], index: 8, kind: input, shape index: {}]   ;;  %s4236_s9 = inlined_call_operand.vmem [shape: f32[1,128], index: 9, kind: input, shape index: {}]   ;;  %s4237_s10 = inlined_call_operand.hbm [shape: bf16[128,256], index: 10, kind: input, shape index: {}]   ;;  %s4238_s11 = inlined_call_operand.vmem [shape: f32[1,256], index: 11, kind: input, shape index: {}]   ;;  %s4239_s12 = inlined_call_operand.hbm [shape: bf16[256,1024], index: 12, kind: input, shape index: {}]   ;;  %s4240_s13 = inlined_call_operand.vmem [shape: f32[1,1024], index: 13, kind: input, shape index: {}]   ;;  %s4241_s14 = inlined_call_operand.hbm [shape: f32[16,1024], index: 14, kind: output, shape index: {0}]   ;;  %s4242_s15 = inlined_call_operand.hbm [shape: f32[16,128], index: 15, kind: output, shape index: {1}]  }
   0x1   :  { %4244 = sst [smem:[#allocation26_spill]] %s4241_s14 }
   0x2   :  { %21 = vsyncpa [#allocation3], 0 }
   0x3   :  { %22 = vsyncpa [#allocation6], 0 }
   0x4   :  { %23 = vsyncpa [#allocation9], 0 }
   0x5   :  { %24 = vsyncpa [#allocation12], 0 }
   0x6   :  { %25 = vsyncpa [#allocation15], 0 }
   0x7   :  { %26 = vsyncpa [#allocation4], 0 }
   0x8   :  { %27 = vsyncpa [#allocation18], 0  ;;  %s3909_s18 = smov [#allocation5]   ;;  %s3675_s22 = scalar_lea.hbm %s4228_s1, 256 }
   0x9   :  { %s45_s19 = sshll.u32 %s3909_s18, 4  ;;  %p3676_p0 = scmp.ne.s32.totalorder %s4228_s1, %s3675_s22  ;;  %s46_s19 = int_to_ptr.vmem [resolvable:$true] %s45_s19 }
   0xa   :  { %p3679_p1 = scmp.lt.u32.totalorder %s3675_s22, %s4228_s1 }
   0xc   :  { %p3681_p2 = pnand %p3679_p1, %p3676_p0 }
   0xe   :  { %3684 = shalt.err (!%p3681_p2)
}
   0xf   :  { %s3685_s27 = scalar_lea.vmem %s46_s19, 256  ;;  %p3690_p4 = scmp.lt.s32.totalorder %s46_s19, %s46_s19 }
  0x10   :  { %p3686_p3 = scmp.ne.s32.totalorder %s46_s19, %s3685_s27  ;;  %p3691_p5 = scmp.lt.s32.totalorder %s3685_s27, %s3685_s27 }
  0x12   :  { %p3692_p6 = por %p3691_p5, %p3690_p4 }
  0x14   :  { %p3693_p7 = pnand %p3692_p6, %p3686_p3 }
  0x16   :  { %3696 = shalt.err (!%p3693_p7)
}
  0x17   :  { %s3910_s28 = smov 128   ;;  %s3911_s29 = smov 8  }
  0x18   :  { %51 = dma.hbm_to_vmem [thread:$0]  %s4228_s1, 256, %s46_s19, [#allocation6], %s3910_s28, %s3910_s28, %s3911_s29  }
  0x19   :  { %s3912_s17 = smov [#allocation8]   ;;  %s3913_s20 = smov [#allocation11]  }
  0x1a   :  { %s71_s18 = sshll.u32 %s3912_s17, 4  ;;  %s99_s21 = sshll.u32 %s3913_s20, 4  ;;  %s72_s18 = int_to_ptr.vmem [resolvable:$true] %s71_s18  ;;  %s100_s21 = int_to_ptr.vmem [resolvable:$true] %s99_s21 }
  0x1b   :  { %s3697_s24 = scalar_lea.hbm %s4231_s4, 2048 }
  0x1c   :  { %p3698_p8 = scmp.ne.s32.totalorder %s4231_s4, %s3697_s24  ;;  %p3701_p9 = scmp.lt.u32.totalorder %s3697_s24, %s4231_s4 }
  0x1e   :  { %p3703_p10 = pnand %p3701_p9, %p3698_p8 }
  0x20   :  { %3706 = shalt.err (!%p3703_p10)
}
  0x21   :  { %s3707_s1 = scalar_lea.vmem %s72_s18, 2048  ;;  %p3712_p12 = scmp.lt.s32.totalorder %s72_s18, %s72_s18 }
  0x22   :  { %p3708_p11 = scmp.ne.s32.totalorder %s72_s18, %s3707_s1  ;;  %p3713_p13 = scmp.lt.s32.totalorder %s3707_s1, %s3707_s1 }
  0x24   :  { %p3714_p0 = por %p3713_p13, %p3712_p12 }
  0x26   :  { %p3715_p1 = pnand %p3714_p0, %p3708_p11 }
  0x28   :  { %3718 = shalt.err (!%p3715_p1)
}
  0x29   :  { %s3914_s19 = smov 64   ;;  %s3915_s30 = smov 4  }
  0x2a   :  { %77 = dma.hbm_to_vmem [thread:$0]  %s4231_s4, 2048, %s72_s18, [#allocation9], %s3914_s19, %s3914_s19, %s3915_s30  }
  0x2b   :  { %s3719_s22 = scalar_lea.hbm %s4235_s8, 2048 }
  0x2c   :  { %p3720_p2 = scmp.ne.s32.totalorder %s4235_s8, %s3719_s22  ;;  %p3723_p3 = scmp.lt.u32.totalorder %s3719_s22, %s4235_s8 }
  0x2e   :  { %p3725_p4 = pnand %p3723_p3, %p3720_p2 }
  0x30   :  { %3728 = shalt.err (!%p3725_p4)
}
  0x31   :  { %s3729_s27 = scalar_lea.vmem %s100_s21, 2048  ;;  %p3734_p6 = scmp.lt.s32.totalorder %s100_s21, %s100_s21 }
  0x32   :  { %p3730_p5 = scmp.ne.s32.totalorder %s100_s21, %s3729_s27  ;;  %p3735_p7 = scmp.lt.s32.totalorder %s3729_s27, %s3729_s27 }
  0x34   :  { %p3736_p8 = por %p3735_p7, %p3734_p6 }
  0x36   :  { %p3737_p9 = pnand %p3736_p8, %p3730_p5 }
  0x38   :  { %3740 = shalt.err (!%p3737_p9)
}
  0x39   :  { %105 = dma.hbm_to_vmem [thread:$0]  %s4235_s8, 2048, %s100_s21, [#allocation12], %s3910_s28, %s3910_s28, %s3911_s29  }
  0x3a   :  { %s3916_s1 = smov [#allocation2]   ;;  %s3741_s14 = scalar_lea.hbm %s4227_s0, 2048 }
  0x3b   :  { %s33_s30 = sshll.u32 %s3916_s1, 4  ;;  %p3742_p10 = scmp.ne.s32.totalorder %s4227_s0, %s3741_s14  ;;  %s34_s30 = int_to_ptr.vmem [resolvable:$true] %s33_s30 }
  0x3c   :  { %p3745_p11 = scmp.lt.u32.totalorder %s3741_s14, %s4227_s0 }
  0x3e   :  { %p3747_p12 = pnand %p3745_p11, %p3742_p10 }
  0x40   :  { %3750 = shalt.err (!%p3747_p12)
}
  0x41   :  { %s3751_s25 = scalar_lea.vmem %s34_s30, 2048  ;;  %p3756_p0 = scmp.lt.s32.totalorder %s34_s30, %s34_s30 }
  0x42   :  { %p3752_p13 = scmp.ne.s32.totalorder %s34_s30, %s3751_s25  ;;  %p3757_p1 = scmp.lt.s32.totalorder %s3751_s25, %s3751_s25 }
  0x44   :  { %p3758_p2 = por %p3757_p1, %p3756_p0 }
  0x46   :  { %p3759_p3 = pnand %p3758_p2, %p3752_p13 }
  0x48   :  { %3762 = shalt.err (!%p3759_p3)
}
  0x49   :  { %s3917_s8 = smov 1024   ;;  %s3918_s27 = smov [#allocation7]  }
  0x4a   :  { %39 = dma.hbm_to_vmem [thread:$0]  %s4227_s0, 2048, %s34_s30, [#allocation3], %s3917_s8, %s3917_s8, %s3914_s19  }
  0x4b   :  { %s57_s4 = sshll.u32 %s3918_s27, 4  ;;  %s3919_s18 = smov [#allocation10]   ;;  %s58_s4 = int_to_ptr.vmem [resolvable:$true] %s57_s4 }
  0x4c   :  { %s85_s1 = sshll.u32 %s3919_s18, 4  ;;  %s3763_s14 = scalar_lea.hbm %s4229_s2, 16384  ;;  %s86_s1 = int_to_ptr.vmem [resolvable:$true] %s85_s1 }
  0x4d   :  { %p3764_p4 = scmp.ne.s32.totalorder %s4229_s2, %s3763_s14  ;;  %p3767_p5 = scmp.lt.u32.totalorder %s3763_s14, %s4229_s2 }
  0x4f   :  { %p3769_p6 = pnand %p3767_p5, %p3764_p4 }
  0x51   :  { %3772 = shalt.err (!%p3769_p6)
}
  0x52   :  { %s3773_s0 = scalar_lea.vmem %s58_s4, 16384  ;;  %p3778_p8 = scmp.lt.s32.totalorder %s58_s4, %s58_s4 }
  0x53   :  { %p3774_p7 = scmp.ne.s32.totalorder %s58_s4, %s3773_s0  ;;  %p3779_p9 = scmp.lt.s32.totalorder %s3773_s0, %s3773_s0 }
  0x55   :  { %p3780_p10 = por %p3779_p9, %p3778_p8 }
  0x57   :  { %p3781_p11 = pnand %p3780_p10, %p3774_p7 }
  0x59   :  { %3784 = shalt.err (!%p3781_p11)
}
  0x5a   :  { %63 = dma.hbm_to_vmem [thread:$0]  %s4229_s2, 16384, %s58_s4, [#allocation6], %s3910_s28, %s3910_s28, %s3911_s29  }
  0x5b   :  { %s3785_s27 = scalar_lea.hbm %s4233_s6, 2048 }
  0x5c   :  { %p3786_p12 = scmp.ne.s32.totalorder %s4233_s6, %s3785_s27  ;;  %p3789_p13 = scmp.lt.u32.totalorder %s3785_s27, %s4233_s6 }
  0x5e   :  { %p3791_p0 = pnand %p3789_p13, %p3786_p12 }
  0x60   :  { %3794 = shalt.err (!%p3791_p0)
}
  0x61   :  { %s3795_s20 = scalar_lea.vmem %s86_s1, 2048  ;;  %p3800_p2 = scmp.lt.s32.totalorder %s86_s1, %s86_s1 }
  0x62   :  { %p3796_p1 = scmp.ne.s32.totalorder %s86_s1, %s3795_s20  ;;  %p3801_p3 = scmp.lt.s32.totalorder %s3795_s20, %s3795_s20 }
  0x64   :  { %p3802_p4 = por %p3801_p3, %p3800_p2 }
  0x66   :  { %p3803_p5 = pnand %p3802_p4, %p3796_p1 }
  0x68   :  { %3806 = shalt.err (!%p3803_p5)
}
  0x69   :  { %91 = dma.hbm_to_vmem [thread:$0]  %s4233_s6, 2048, %s86_s1, [#allocation9], %s3910_s28, %s3910_s28, %s3911_s29  }
  0x6a   :  { %s3920_s22 = smov [#allocation13]   ;;  %s3921_s24 = smov [#allocation14]  }
  0x6b   :  { %s113_s23 = sshll.u32 %s3920_s22, 4  ;;  %s127_s0 = sshll.u32 %s3921_s24, 4  ;;  %s114_s23 = int_to_ptr.vmem [resolvable:$true] %s113_s23  ;;  %s128_s0 = int_to_ptr.vmem [resolvable:$true] %s127_s0 }
  0x6c   :  { %s3807_s21 = scalar_lea.hbm %s4237_s10, 2048 }
  0x6d   :  { %p3808_p6 = scmp.ne.s32.totalorder %s4237_s10, %s3807_s21  ;;  %p3811_p7 = scmp.lt.u32.totalorder %s3807_s21, %s4237_s10 }
  0x6f   :  { %p3813_p8 = pnand %p3811_p7, %p3808_p6 }
  0x71   :  { %3816 = shalt.err (!%p3813_p8)
}
  0x72   :  { %s3817_s6 = scalar_lea.vmem %s114_s23, 2048  ;;  %p3822_p10 = scmp.lt.s32.totalorder %s114_s23, %s114_s23 }
  0x73   :  { %p3818_p9 = scmp.ne.s32.totalorder %s114_s23, %s3817_s6  ;;  %p3823_p11 = scmp.lt.s32.totalorder %s3817_s6, %s3817_s6 }
  0x75   :  { %p3824_p12 = por %p3823_p11, %p3822_p10 }
  0x77   :  { %p3825_p13 = pnand %p3824_p12, %p3818_p9 }
  0x79   :  { %3828 = shalt.err (!%p3825_p13)
}
  0x7a   :  { %119 = dma.hbm_to_vmem [thread:$0]  %s4237_s10, 2048, %s114_s23, [#allocation12], %s3910_s28, %s3910_s28, %s3911_s29  }
  0x7b   :  { %s3829_s2 = scalar_lea.hbm %s4239_s12, 16384 }
  0x7c   :  { %p3830_p0 = scmp.ne.s32.totalorder %s4239_s12, %s3829_s2  ;;  %p3833_p1 = scmp.lt.u32.totalorder %s3829_s2, %s4239_s12 }
  0x7e   :  { %p3835_p2 = pnand %p3833_p1, %p3830_p0 }
  0x80   :  { %3838 = shalt.err (!%p3835_p2)
}
  0x81   :  { %s3839_s25 = scalar_lea.vmem %s128_s0, 16384  ;;  %p3844_p4 = scmp.lt.s32.totalorder %s128_s0, %s128_s0 }
  0x82   :  { %p3840_p3 = scmp.ne.s32.totalorder %s128_s0, %s3839_s25  ;;  %p3845_p5 = scmp.lt.s32.totalorder %s3839_s25, %s3839_s25 }
  0x84   :  { %p3846_p6 = por %p3845_p5, %p3844_p4 }
  0x86   :  { %p3847_p7 = pnand %p3846_p6, %p3840_p3 }
  0x88   :  { %3850 = shalt.err (!%p3847_p7)
}
  0x89   :  { %s3922_s10 = smov 512   ;;  %s3923_s23 = smov 32  }
  0x8a   :  { %133 = dma.hbm_to_vmem [thread:$0]  %s4239_s12, 16384, %s128_s0, [#allocation15], %s3922_s10, %s3922_s10, %s3923_s23  }
  0x8b   :  { %3895 = dma.done.wait [#allocation3], 2048  }
  0x8c   :  { %3896 = vsyncadd [#allocation3], 4294965248 }
  0x8d   :  { %3897 = dma.done.wait [#allocation6], 16640  }
  0x8e   :  { %3898 = vsyncadd [#allocation6], 4294950656 }
  0x8f   :  { %3899 = dma.done.wait [#allocation9], 4096  }
  0x90   :  { %3900 = vsyncadd [#allocation9], 4294963200 }
  0x91   :  { %3901 = dma.done.wait [#allocation12], 4096  }
  0x92   :  { %3902 = vsyncadd [#allocation12], 4294963200 }
  0x93   :  { %3903 = dma.done.wait [#allocation15], 16384  }
  0x94   :  { %3904 = vsyncadd [#allocation15], 4294950912  ;;  %v3375_v0 = vld [vmem:[#allocation7 + $0x4] ss:$8 sps:$4 sm:$0xff]   ;;  %v3377_v1 = vld [vmem:[#allocation7] ss:$8 sps:$4 sm:$0xff]  }
  0x95   :  { %966 = vmatprep.subr.bf16.mxu0 %v3375_v0  ;;  %v3378_v2 = vld [vmem:[#allocation7 + $0x14] ss:$8 sps:$4 sm:$0xff]   ;;  %v3380_v3 = vld [vmem:[#allocation7 + $0x10] ss:$8 sps:$4 sm:$0xff]   ;;  %v3381_v4 = vld [vmem:[#allocation7 + $0x24] ss:$8 sps:$4 sm:$0xff]  }
  0x96   :  { %967 = vmatpush1.bf16.msra.mxu0 %v3377_v1  ;;  %v3383_v5 = vld [vmem:[#allocation7 + $0x20] ss:$8 sps:$4 sm:$0xff]   ;;  %v3384_v6 = vld [vmem:[#allocation7 + $0x34] ss:$8 sps:$4 sm:$0xff]   ;;  %v3386_v7 = vld [vmem:[#allocation7 + $0x30] ss:$8 sps:$4 sm:$0xff]  }
  0x97   :  { %968 = vmatprep.subr.bf16.mxu0 %v3378_v2  ;;  %v3387_v8 = vld [vmem:[#allocation7 + $0x44] ss:$8 sps:$4 sm:$0xff]   ;;  %v3389_v9 = vld [vmem:[#allocation7 + $0x40] ss:$8 sps:$4 sm:$0xff]   ;;  %v3390_v10 = vld [vmem:[#allocation7 + $0x54] ss:$8 sps:$4 sm:$0xff]  }
  0x98   :  { %v3392_v11 = vld [vmem:[#allocation7 + $0x50] ss:$8 sps:$4 sm:$0xff]   ;;  %v3393_v12 = vld [vmem:[#allocation7 + $0x64] ss:$8 sps:$4 sm:$0xff]   ;;  %v3395_v16 = vld [vmem:[#allocation7 + $0x60] ss:$8 sps:$4 sm:$0xff]  }
  0x99   :  { %v163_v13 = vld [vmem:[#allocation2 + $0x8] sm:$0xff]  ;;  %v3399_v19 = vld [vmem:[#allocation7 + $0x84] ss:$8 sps:$4 sm:$0xff]   ;;  %v3401_v20 = vld [vmem:[#allocation7 + $0x80] ss:$8 sps:$4 sm:$0xff]   ;;  %s3924_s16 = smov 96  }
  0x9a   :  { %969 = vmatpush1.bf16.msra.mxu0 %v3380_v3  ;;  %v171_v14 = vld [vmem:[#allocation2 + $0x48] sm:$0xff]  ;;  %v3405_v23 = vld [vmem:[#allocation7 + $0xa4] ss:$8 sps:$4 sm:$0xff]   ;;  %v3407_v24 = vld [vmem:[#allocation7 + $0xa0] ss:$8 sps:$4 sm:$0xff]  }
  0x9b   :  { %970 = vmatprep.subr.bf16.mxu0 %v3381_v4  ;;  %v179_v15 = vpack.c.bf16 %v171_v14, %v163_v13  ;;  %v3396_v17 = vld [vmem:[#allocation7 + $0x74] ss:$8 sps:$4 sm:$0xff]   ;;  %v3398_v18 = vld [vmem:[#allocation7 + $0x70] ss:$8 sps:$4 sm:$0xff]   ;;  %v3411_v27 = vld [vmem:[#allocation7 + $0xc4] ss:$8 sps:$4 sm:$0xff]  }
  0x9c   :  { %v3402_v21 = vld [vmem:[#allocation7 + $0x94] ss:$8 sps:$4 sm:$0xff]   ;;  %v3404_v22 = vld [vmem:[#allocation7 + $0x90] ss:$8 sps:$4 sm:$0xff]   ;;  %v3413_v28 = vld [vmem:[#allocation7 + $0xc0] ss:$8 sps:$4 sm:$0xff]  }
  0x9d   :  { %998 = vmatprep.mubr.bf16.mxu0 %v179_v15  ;;  %v3408_v25 = vld [vmem:[#allocation7 + $0xb4] ss:$8 sps:$4 sm:$0xff]   ;;  %v3410_v26 = vld [vmem:[#allocation7 + $0xb0] ss:$8 sps:$4 sm:$0xff]   ;;  %v3417_v31 = vld [vmem:[#allocation7 + $0xe4] ss:$8 sps:$4 sm:$0xff]  }
  0x9e   :  { %971 = vmatpush1.bf16.msra.mxu0 %v3383_v5  ;;  %v3414_v29 = vld [vmem:[#allocation7 + $0xd4] ss:$8 sps:$4 sm:$0xff]   ;;  %v3416_v30 = vld [vmem:[#allocation7 + $0xd0] ss:$8 sps:$4 sm:$0xff]   ;;  %v3419_v32 = vld [vmem:[#allocation7 + $0xe0] ss:$8 sps:$4 sm:$0xff]  }
  0x9f   :  { %972 = vmatprep.subr.bf16.mxu0 %v3384_v6  ;;  %v3420_v33 = vld [vmem:[#allocation7 + $0xf4] ss:$8 sps:$4 sm:$0xff]   ;;  %v3422_v34 = vld [vmem:[#allocation7 + $0xf0] ss:$8 sps:$4 sm:$0xff]   ;;  %v3425_v35 = vld [vmem:[#allocation7 + $0x104] ss:$8 sps:$4 sm:$0xff]  }
  0xa0   :  { %v162_v36 = vld [vmem:[#allocation2] sm:$0xff]  ;;  %v165_v38 = vld [vmem:[#allocation2 + $0x18] sm:$0xff]  ;;  %v175_v13 = vld [vmem:[#allocation2 + $0x68] sm:$0xff] }
  0xa1   :  { %v170_v37 = vld [vmem:[#allocation2 + $0x40] sm:$0xff]  ;;  %v173_v39 = vld [vmem:[#allocation2 + $0x58] sm:$0xff] }
  0xa2   :  { %973 = vmatpush1.bf16.msra.mxu0 %v3386_v7  ;;  %v178_v40 = vpack.c.bf16 %v170_v37, %v162_v36  ;;  %v3423_v41 = vld [vmem:[#allocation7 + $0x100] ss:$8 sps:$4 sm:$0xff]   ;;  %v181_v42 = vpack.c.bf16 %v173_v39, %v165_v38  ;;  %v3428_v43 = vld [vmem:[#allocation7 + $0x114] ss:$8 sps:$4 sm:$0xff]   ;;  %v3426_v44 = vld [vmem:[#allocation7 + $0x110] ss:$8 sps:$4 sm:$0xff]  }
  0xa3   :  { %974 = vmatprep.subr.bf16.mxu0 %v3387_v8  ;;  %v3431_v45 = vld [vmem:[#allocation7 + $0x124] ss:$8 sps:$4 sm:$0xff]   ;;  %v3429_v46 = vld [vmem:[#allocation7 + $0x120] ss:$8 sps:$4 sm:$0xff]   ;;  %v3434_v47 = vld [vmem:[#allocation7 + $0x134] ss:$8 sps:$4 sm:$0xff]  }
  0xa4   :  { %v3432_v48 = vld [vmem:[#allocation7 + $0x130] ss:$8 sps:$4 sm:$0xff]   ;;  %v3437_v49 = vld [vmem:[#allocation7 + $0x144] ss:$8 sps:$4 sm:$0xff]   ;;  %v3435_v50 = vld [vmem:[#allocation7 + $0x140] ss:$8 sps:$4 sm:$0xff]  }
  0xa5   :  { %v3440_v51 = vld [vmem:[#allocation7 + $0x154] ss:$8 sps:$4 sm:$0xff]   ;;  %v3438_v52 = vld [vmem:[#allocation7 + $0x150] ss:$8 sps:$4 sm:$0xff]   ;;  %v3443_v53 = vld [vmem:[#allocation7 + $0x164] ss:$8 sps:$4 sm:$0xff]  }
  0xa6   :  { %975 = vmatpush1.bf16.msra.mxu0 %v3389_v9  ;;  %v3441_v54 = vld [vmem:[#allocation7 + $0x160] ss:$8 sps:$4 sm:$0xff]   ;;  %v3446_v55 = vld [vmem:[#allocation7 + $0x174] ss:$8 sps:$4 sm:$0xff]   ;;  %v3444_v56 = vld [vmem:[#allocation7 + $0x170] ss:$8 sps:$4 sm:$0xff]  }
  0xa7   :  { %976 = vmatprep.subr.bf16.mxu0 %v3390_v10  ;;  %v3449_v57 = vld [vmem:[#allocation7 + $0x184] ss:$8 sps:$4 sm:$0xff]   ;;  %v3447_v58 = vld [vmem:[#allocation7 + $0x180] ss:$8 sps:$4 sm:$0xff]   ;;  %v3452_v59 = vld [vmem:[#allocation7 + $0x194] ss:$8 sps:$4 sm:$0xff]  }
  0xa8   :  { %v3450_v60 = vld [vmem:[#allocation7 + $0x190] ss:$8 sps:$4 sm:$0xff]   ;;  %v3455_v61 = vld [vmem:[#allocation7 + $0x1a4] ss:$8 sps:$4 sm:$0xff]   ;;  %v3453_v62 = vld [vmem:[#allocation7 + $0x1a0] ss:$8 sps:$4 sm:$0xff]  }
  0xa9   :  { %v3458_v63 = vld [vmem:[#allocation7 + $0x1b4] ss:$8 sps:$4 sm:$0xff]   ;;  %v3456_v0 = vld [vmem:[#allocation7 + $0x1b0] ss:$8 sps:$4 sm:$0xff]   ;;  %v3461_v1 = vld [vmem:[#allocation7 + $0x1c4] ss:$8 sps:$4 sm:$0xff]  }
  0xaa   :  { %977 = vmatpush1.bf16.msra.mxu0 %v3392_v11  ;;  %v3459_v2 = vld [vmem:[#allocation7 + $0x1c0] ss:$8 sps:$4 sm:$0xff]   ;;  %v3464_v3 = vld [vmem:[#allocation7 + $0x1d4] ss:$8 sps:$4 sm:$0xff]   ;;  %v3462_v4 = vld [vmem:[#allocation7 + $0x1d0] ss:$8 sps:$4 sm:$0xff]  }
  0xab   :  { %978 = vmatprep.subr.bf16.mxu0 %v3393_v12  ;;  %v3467_v5 = vld [vmem:[#allocation7 + $0x1e4] ss:$8 sps:$4 sm:$0xff]   ;;  %v3465_v6 = vld [vmem:[#allocation7 + $0x1e0] ss:$8 sps:$4 sm:$0xff]   ;;  %v3470_v7 = vld [vmem:[#allocation7 + $0x1f4] ss:$8 sps:$4 sm:$0xff]  }
  0xac   :  { %v3468_v8 = vld [vmem:[#allocation7 + $0x1f0] ss:$8 sps:$4 sm:$0xff]   ;;  %v164_v9 = vld [vmem:[#allocation2 + $0x10] sm:$0xff]  ;;  %v3494_v39 = vld [vmem:[#allocation7 + $0x274] ss:$8 sps:$4 sm:$0xff]  }
  0xad   :  { %v172_v10 = vld [vmem:[#allocation2 + $0x50] sm:$0xff]  ;;  %v167_v12 = vld [vmem:[#allocation2 + $0x28] sm:$0xff] }
  0xae   :  { %979 = vmatpush1.bf16.msra.mxu0 %v3395_v16  ;;  %v3473_v11 = vld [vmem:[#allocation7 + $0x204] ss:$8 sps:$4 sm:$0xff]   ;;  %v180_v14 = vpack.c.bf16 %v172_v10, %v164_v9  ;;  %v3471_v15 = vld [vmem:[#allocation7 + $0x200] ss:$8 sps:$4 sm:$0xff]   ;;  %v183_v16 = vpack.c.bf16 %v175_v13, %v167_v12  ;;  %v3486_v36 = vld [vmem:[#allocation7 + $0x250] ss:$8 sps:$4 sm:$0xff]  }
  0xaf   :  { %980 = vmatprep.subr.bf16.mxu0 %v3396_v17  ;;  %v3476_v17 = vld [vmem:[#allocation7 + $0x214] ss:$8 sps:$4 sm:$0xff]   ;;  %v3491_v37 = vld [vmem:[#allocation7 + $0x264] ss:$8 sps:$4 sm:$0xff]   ;;  %v3489_v38 = vld [vmem:[#allocation7 + $0x260] ss:$8 sps:$4 sm:$0xff]  }
  0xb0   :  { %v3536_v9 = vld [vmem:[#allocation7 + $0x354] ss:$8 sps:$4 sm:$0xff]   ;;  %v3534_v10 = vld [vmem:[#allocation7 + $0x350] ss:$8 sps:$4 sm:$0xff]   ;;  %v3537_v12 = vld [vmem:[#allocation7 + $0x360] ss:$8 sps:$4 sm:$0xff]  }
  0xb1   :  { %v3542_v13 = vld [vmem:[#allocation7 + $0x374] ss:$8 sps:$4 sm:$0xff]  }
  0xb2   :  { %981 = vmatpush1.bf16.msra.mxu0 %v3398_v18  ;;  %v3567_v18 = vld [vmem:[#allocation8 + $0x40] sm:$0xff]  }
  0xb3   :  { %982 = vmatprep.subr.bf16.mxu0 %v3399_v19  ;;  %v3568_v19 = vld [vmem:[#allocation8] sm:$0xff]   ;;  %3148 = vmatprep.subr.bf16.mxu1 %v3567_v18  ;;  %v3546_v18 = vld [vmem:[#allocation7 + $0x390] ss:$8 sps:$4 sm:$0xff]  }
  0xb4   :  { %3149 = vmatpush3.bf16.msra.mxu1 %v3568_v19  ;;  %v3551_v19 = vld [vmem:[#allocation7 + $0x3a4] ss:$8 sps:$4 sm:$0xff]  }
  0xb6   :  { %983 = vmatpush1.bf16.msra.mxu0 %v3401_v20  ;;  %v3569_v20 = vld [vmem:[#allocation8 + $0x48] sm:$0xff]  }
  0xb7   :  { %984 = vmatprep.subr.bf16.mxu0 %v3402_v21  ;;  %v3474_v21 = vld [vmem:[#allocation7 + $0x210] ss:$8 sps:$4 sm:$0xff]   ;;  %3150 = vmatprep.subr.bf16.mxu1 %v3569_v20  ;;  %v3549_v20 = vld [vmem:[#allocation7 + $0x3a0] ss:$8 sps:$4 sm:$0xff]  }
  0xba   :  { %985 = vmatpush1.bf16.msra.mxu0 %v3404_v22  ;;  %v3479_v22 = vld [vmem:[#allocation7 + $0x224] ss:$8 sps:$4 sm:$0xff]  }
  0xbb   :  { %986 = vmatprep.subr.bf16.mxu0 %v3405_v23  ;;  %v3570_v23 = vld [vmem:[#allocation8 + $0x8] sm:$0xff]  }
  0xbc   :  { %3151 = vmatpush3.bf16.msra.mxu1 %v3570_v23  ;;  %v3557_v23 = vld [vmem:[#allocation7 + $0x3c4] ss:$8 sps:$4 sm:$0xff]  }
  0xbe   :  { %987 = vmatpush1.bf16.msra.mxu0 %v3407_v24  ;;  %v3571_v24 = vld [vmem:[#allocation8 + $0x50] sm:$0xff]  }
  0xbf   :  { %988 = vmatprep.subr.bf16.mxu0 %v3408_v25  ;;  %v3477_v25 = vld [vmem:[#allocation7 + $0x220] ss:$8 sps:$4 sm:$0xff]   ;;  %3152 = vmatprep.subr.bf16.mxu1 %v3571_v24 }
  0xc0   :  { %v3555_v24 = vld [vmem:[#allocation7 + $0x3c0] ss:$8 sps:$4 sm:$0xff]  }
  0xc2   :  { %989 = vmatpush1.bf16.msra.mxu0 %v3410_v26  ;;  %v3482_v26 = vld [vmem:[#allocation7 + $0x234] ss:$8 sps:$4 sm:$0xff]  }
  0xc3   :  { %990 = vmatprep.subr.bf16.mxu0 %v3411_v27  ;;  %v3572_v27 = vld [vmem:[#allocation8 + $0x10] sm:$0xff]  }
  0xc4   :  { %3153 = vmatpush3.bf16.msra.mxu1 %v3572_v27  ;;  %v3563_v27 = vld [vmem:[#allocation7 + $0x3e4] ss:$8 sps:$4 sm:$0xff]  }
  0xc6   :  { %991 = vmatpush1.bf16.msra.mxu0 %v3413_v28  ;;  %v3573_v28 = vld [vmem:[#allocation8 + $0x58] sm:$0xff]  }
  0xc7   :  { %992 = vmatprep.subr.bf16.mxu0 %v3414_v29  ;;  %v3480_v29 = vld [vmem:[#allocation7 + $0x230] ss:$8 sps:$4 sm:$0xff]   ;;  %3154 = vmatprep.subr.bf16.mxu1 %v3573_v28  ;;  %v3561_v28 = vld [vmem:[#allocation7 + $0x3e0] ss:$8 sps:$4 sm:$0xff]  }
  0xca   :  { %993 = vmatpush1.bf16.msra.mxu0 %v3416_v30  ;;  %v3485_v30 = vld [vmem:[#allocation7 + $0x244] ss:$8 sps:$4 sm:$0xff]  }
  0xcb   :  { %994 = vmatprep.subr.bf16.mxu0 %v3417_v31  ;;  %v3574_v31 = vld [vmem:[#allocation8 + $0x18] sm:$0xff]  }
  0xcc   :  { %3155 = vmatpush3.bf16.msra.mxu1 %v3574_v31  ;;  %v168_v31 = vld [vmem:[#allocation2 + $0x30] sm:$0xff] }
  0xce   :  { %995 = vmatpush1.bf16.msra.mxu0 %v3419_v32  ;;  %v3575_v32 = vld [vmem:[#allocation8 + $0x60] sm:$0xff]  }
  0xcf   :  { %996 = vmatprep.subr.bf16.mxu0 %v3420_v33  ;;  %v3483_v33 = vld [vmem:[#allocation7 + $0x240] ss:$8 sps:$4 sm:$0xff]   ;;  %3156 = vmatprep.subr.bf16.mxu1 %v3575_v32 }
  0xd0   :  { %v176_v32 = vld [vmem:[#allocation2 + $0x70] sm:$0xff] }
  0xd2   :  { %997 = vmatpush1.bf16.msra.mxu0 %v3422_v34  ;;  %v3488_v34 = vld [vmem:[#allocation7 + $0x254] ss:$8 sps:$4 sm:$0xff]  }
  0xd3   :  { %1009 = vmatprep.subr.bf16.mxu0 %v3425_v35  ;;  %v3576_v35 = vld [vmem:[#allocation8 + $0x20] sm:$0xff]  }
  0xd4   :  { %3157 = vmatpush3.bf16.msra.mxu1 %v3576_v35  ;;  %v3578_v35 = vld [vmem:[#allocation8 + $0x28] sm:$0xff]  }
  0xd5   :  { %999 = vmatmul.mubr.bf16.vlgmr.msra.gmra.mrb[0].mxu0 %v178_v40  ;;  %v3492_v40 = vld [vmem:[#allocation7 + $0x270] ss:$8 sps:$4 sm:$0xff]  }
  0xd6   :  { %1010 = vmatpush1.bf16.msra.mxu0 %v3423_v41  ;;  %1041 = vmatprep.mubr.bf16.mxu0 %v181_v42  ;;  %v3497_v41 = vld [vmem:[#allocation7 + $0x284] ss:$8 sps:$4 sm:$0xff]   ;;  %v3495_v42 = vld [vmem:[#allocation7 + $0x280] ss:$8 sps:$4 sm:$0xff]  }
  0xd7   :  { %1011 = vmatprep.subr.bf16.mxu0 %v3428_v43  ;;  %v3500_v43 = vld [vmem:[#allocation7 + $0x294] ss:$8 sps:$4 sm:$0xff]  }
  0xda   :  { %1012 = vmatpush1.bf16.msra.mxu0 %v3426_v44  ;;  %v3498_v44 = vld [vmem:[#allocation7 + $0x290] ss:$8 sps:$4 sm:$0xff]  }
  0xdb   :  { %1013 = vmatprep.subr.bf16.mxu0 %v3431_v45  ;;  %v3503_v45 = vld [vmem:[#allocation7 + $0x2a4] ss:$8 sps:$4 sm:$0xff]  }
  0xde   :  { %1014 = vmatpush1.bf16.msra.mxu0 %v3429_v46  ;;  %v3501_v46 = vld [vmem:[#allocation7 + $0x2a0] ss:$8 sps:$4 sm:$0xff]  }
  0xdf   :  { %1015 = vmatprep.subr.bf16.mxu0 %v3434_v47  ;;  %v3506_v47 = vld [vmem:[#allocation7 + $0x2b4] ss:$8 sps:$4 sm:$0xff]  }
  0xe2   :  { %1016 = vmatpush1.bf16.msra.mxu0 %v3432_v48  ;;  %v3504_v48 = vld [vmem:[#allocation7 + $0x2b0] ss:$8 sps:$4 sm:$0xff]  }
  0xe3   :  { %1017 = vmatprep.subr.bf16.mxu0 %v3437_v49  ;;  %v3509_v49 = vld [vmem:[#allocation7 + $0x2c4] ss:$8 sps:$4 sm:$0xff]  }
  0xe6   :  { %1018 = vmatpush1.bf16.msra.mxu0 %v3435_v50  ;;  %v3507_v50 = vld [vmem:[#allocation7 + $0x2c0] ss:$8 sps:$4 sm:$0xff]  }
  0xe7   :  { %1019 = vmatprep.subr.bf16.mxu0 %v3440_v51  ;;  %v3512_v51 = vld [vmem:[#allocation7 + $0x2d4] ss:$8 sps:$4 sm:$0xff]  }
  0xea   :  { %1020 = vmatpush1.bf16.msra.mxu0 %v3438_v52  ;;  %v3510_v52 = vld [vmem:[#allocation7 + $0x2d0] ss:$8 sps:$4 sm:$0xff]  }
  0xeb   :  { %1021 = vmatprep.subr.bf16.mxu0 %v3443_v53  ;;  %v3515_v53 = vld [vmem:[#allocation7 + $0x2e4] ss:$8 sps:$4 sm:$0xff]  }
  0xee   :  { %1022 = vmatpush1.bf16.msra.mxu0 %v3441_v54  ;;  %v3513_v54 = vld [vmem:[#allocation7 + $0x2e0] ss:$8 sps:$4 sm:$0xff]  }
  0xef   :  { %1023 = vmatprep.subr.bf16.mxu0 %v3446_v55  ;;  %v3518_v55 = vld [vmem:[#allocation7 + $0x2f4] ss:$8 sps:$4 sm:$0xff]  }
  0xf2   :  { %1024 = vmatpush1.bf16.msra.mxu0 %v3444_v56  ;;  %v3516_v56 = vld [vmem:[#allocation7 + $0x2f0] ss:$8 sps:$4 sm:$0xff]  }
  0xf3   :  { %1025 = vmatprep.subr.bf16.mxu0 %v3449_v57  ;;  %v166_v57 = vld [vmem:[#allocation2 + $0x20] sm:$0xff] }
  0xf6   :  { %1026 = vmatpush1.bf16.msra.mxu0 %v3447_v58  ;;  %v174_v58 = vld [vmem:[#allocation2 + $0x60] sm:$0xff] }
  0xf7   :  { %1027 = vmatprep.subr.bf16.mxu0 %v3452_v59  ;;  %v3521_v59 = vld [vmem:[#allocation7 + $0x304] ss:$8 sps:$4 sm:$0xff]  }
  0xfa   :  { %1028 = vmatpush1.bf16.msra.mxu0 %v3450_v60  ;;  %v169_v60 = vld [vmem:[#allocation2 + $0x38] sm:$0xff] }
  0xfb   :  { %1029 = vmatprep.subr.bf16.mxu0 %v3455_v61  ;;  %v177_v61 = vld [vmem:[#allocation2 + $0x78] sm:$0xff] }
  0xfe   :  { %1030 = vmatpush1.bf16.msra.mxu0 %v3453_v62  ;;  %v182_v62 = vpack.c.bf16 %v174_v58, %v166_v57 }
  0xff   :  { %1031 = vmatprep.subr.bf16.mxu0 %v3458_v63  ;;  %v3519_v63 = vld [vmem:[#allocation7 + $0x300] ss:$8 sps:$4 sm:$0xff]  }
 0x102   :  { %1032 = vmatpush1.bf16.msra.mxu0 %v3456_v0  ;;  %v185_v0 = vpack.c.bf16 %v177_v61, %v169_v60  ;;  %v1330_v61 = vld [vmem:[#allocation10 + $0x10] sm:$0xff] }
 0x103   :  { %1033 = vmatprep.subr.bf16.mxu0 %v3461_v1  ;;  %v3524_v1 = vld [vmem:[#allocation7 + $0x314] ss:$8 sps:$4 sm:$0xff]  }
 0x106   :  { %1034 = vmatpush1.bf16.msra.mxu0 %v3459_v2  ;;  %v3522_v2 = vld [vmem:[#allocation7 + $0x310] ss:$8 sps:$4 sm:$0xff]  }
 0x107   :  { %1035 = vmatprep.subr.bf16.mxu0 %v3464_v3  ;;  %v3527_v3 = vld [vmem:[#allocation7 + $0x324] ss:$8 sps:$4 sm:$0xff]  }
 0x10a   :  { %1036 = vmatpush1.bf16.msra.mxu0 %v3462_v4  ;;  %v3525_v4 = vld [vmem:[#allocation7 + $0x320] ss:$8 sps:$4 sm:$0xff]  }
 0x10b   :  { %1037 = vmatprep.subr.bf16.mxu0 %v3467_v5  ;;  %v3530_v5 = vld [vmem:[#allocation7 + $0x334] ss:$8 sps:$4 sm:$0xff]  }
 0x10e   :  { %1038 = vmatpush1.bf16.msra.mxu0 %v3465_v6  ;;  %v3528_v6 = vld [vmem:[#allocation7 + $0x330] ss:$8 sps:$4 sm:$0xff]  }
 0x10f   :  { %1039 = vmatprep.subr.bf16.mxu0 %v3470_v7  ;;  %v3533_v7 = vld [vmem:[#allocation7 + $0x344] ss:$8 sps:$4 sm:$0xff]  }
 0x112   :  { %1040 = vmatpush1.bf16.msra.mxu0 %v3468_v8  ;;  %v3531_v8 = vld [vmem:[#allocation7 + $0x340] ss:$8 sps:$4 sm:$0xff]  }
 0x113   :  { %1052 = vmatprep.subr.bf16.mxu0 %v3473_v11  ;;  %v3539_v11 = vld [vmem:[#allocation7 + $0x364] ss:$8 sps:$4 sm:$0xff]  }
 0x115   :  { %1042 = vmatmul.mubr.bf16.vlgmr.msra.gmra.mrb[0].mxu0 %v180_v14  ;;  %v3540_v14 = vld [vmem:[#allocation7 + $0x370] ss:$8 sps:$4 sm:$0xff]  }
 0x116   :  { %1053 = vmatpush1.bf16.msra.mxu0 %v3471_v15  ;;  %1084 = vmatprep.mubr.bf16.mxu0 %v183_v16  ;;  %v3545_v15 = vld [vmem:[#allocation7 + $0x384] ss:$8 sps:$4 sm:$0xff]   ;;  %v3543_v16 = vld [vmem:[#allocation7 + $0x380] ss:$8 sps:$4 sm:$0xff]  }
 0x117   :  { %1054 = vmatprep.subr.bf16.mxu0 %v3476_v17  ;;  %v3548_v17 = vld [vmem:[#allocation7 + $0x394] ss:$8 sps:$4 sm:$0xff]  }
 0x11a   :  { %1055 = vmatpush1.bf16.msra.mxu0 %v3474_v21  ;;  %v3554_v21 = vld [vmem:[#allocation7 + $0x3b4] ss:$8 sps:$4 sm:$0xff]  }
 0x11b   :  { %1056 = vmatprep.subr.bf16.mxu0 %v3479_v22  ;;  %v3552_v22 = vld [vmem:[#allocation7 + $0x3b0] ss:$8 sps:$4 sm:$0xff]  }
 0x11e   :  { %1057 = vmatpush1.bf16.msra.mxu0 %v3477_v25  ;;  %v3560_v25 = vld [vmem:[#allocation7 + $0x3d4] ss:$8 sps:$4 sm:$0xff]  }
 0x11f   :  { %1058 = vmatprep.subr.bf16.mxu0 %v3482_v26  ;;  %v3558_v26 = vld [vmem:[#allocation7 + $0x3d0] ss:$8 sps:$4 sm:$0xff]  }
 0x122   :  { %1059 = vmatpush1.bf16.msra.mxu0 %v3480_v29  ;;  %v3566_v29 = vld [vmem:[#allocation7 + $0x3f4] ss:$8 sps:$4 sm:$0xff]  }
 0x123   :  { %1060 = vmatprep.subr.bf16.mxu0 %v3485_v30  ;;  %v3564_v30 = vld [vmem:[#allocation7 + $0x3f0] ss:$8 sps:$4 sm:$0xff]  }
 0x126   :  { %1061 = vmatpush1.bf16.msra.mxu0 %v3483_v33  ;;  %v184_v33 = vpack.c.bf16 %v176_v32, %v168_v31 }
 0x127   :  { %1062 = vmatprep.subr.bf16.mxu0 %v3488_v34  ;;  %v3577_v34 = vld [vmem:[#allocation8 + $0x68] sm:$0xff]  }
 0x128   :  { %3158 = vmatprep.subr.bf16.mxu1 %v3577_v34 }
 0x129   :  { %3159 = vmatpush3.bf16.msra.mxu1 %v3578_v35  ;;  %v1449_v35 = vld [vmem:[#allocation11] sm:$0xff] }
 0x12a   :  { %1063 = vmatpush1.bf16.msra.mxu0 %v3486_v36  ;;  %v3579_v36 = vld [vmem:[#allocation8 + $0x70] sm:$0xff]  }
 0x12b   :  { %1064 = vmatprep.subr.bf16.mxu0 %v3491_v37  ;;  %v3580_v37 = vld [vmem:[#allocation8 + $0x30] sm:$0xff]   ;;  %3160 = vmatprep.subr.bf16.mxu1 %v3579_v36  ;;  %v1450_v36 = vld [vmem:[#allocation11 + $0x8] sm:$0xff] }
 0x12d   :  { %3161 = vmatpush3.bf16.msra.mxu1 %v3580_v37  ;;  %v1451_v37 = vld [vmem:[#allocation11 + $0x10] sm:$0xff] }
 0x12e   :  { %1065 = vmatpush1.bf16.msra.mxu0 %v3489_v38  ;;  %v3581_v38 = vld [vmem:[#allocation8 + $0x78] sm:$0xff]  }
 0x12f   :  { %1066 = vmatprep.subr.bf16.mxu0 %v3494_v39  ;;  %v3582_v39 = vld [vmem:[#allocation8 + $0x38] sm:$0xff]   ;;  %3162 = vmatprep.subr.bf16.mxu1 %v3581_v38  ;;  %v3308_v38 = vpack.c.bf16 %v1450_v36, %v1449_v35  ;;  %v3925_v36 = vmov 0  }
 0x130   :  { %v3604_v35 = vld [vmem:[#allocation13 + $0x70] ss:$8 sps:$4 sm:$0xff]  }
 0x131   :  { %3163 = vmatpush3.bf16.msra.mxu1 %v3582_v39  ;;  %v1452_v39 = vld [vmem:[#allocation11 + $0x18] sm:$0xff] }
 0x132   :  { %1067 = vmatpush1.bf16.msra.mxu0 %v3492_v40  ;;  %v1328_v40 = vld [vmem:[#allocation10] sm:$0xff] }
 0x133   :  { %1068 = vmatprep.subr.bf16.mxu0 %v3497_v41  ;;  %v1329_v41 = vld [vmem:[#allocation10 + $0x8] sm:$0xff] }
 0x136   :  { %1069 = vmatpush1.bf16.msra.mxu0 %v3495_v42  ;;  %v3276_v42 = vpack.c.bf16 %v1329_v41, %v1328_v40  ;;  %v3312_v40 = vpack.c.bf16 %v1452_v39, %v1451_v37  ;;  %v1453_v41 = vld [vmem:[#allocation11 + $0x20] sm:$0xff] }
 0x137   :  { %1070 = vmatprep.subr.bf16.mxu0 %v3500_v43  ;;  %v316_v43 = vlaneseq  ;;  %v4145_v37 = vld [vmem:[#allocation14] sm:$0xff] }
 0x138   :  { %3277 = vmatprep.subr.bf16.mxu1 %v3276_v42 }
 0x13a   :  { %1071 = vmatpush1.bf16.msra.mxu0 %v3498_v44  ;;  %v4125_v44 = vshrl.u32 %v316_v43, 7 }
 0x13b   :  { %1072 = vmatprep.subr.bf16.mxu0 %v3503_v45 }
 0x13c   :  { %v4128_v45 = vsub.s32 0, %v4125_v44 }
 0x13e   :  { %1073 = vmatpush1.bf16.msra.mxu0 %v3501_v46  ;;  %v314_v46 = vld [vmem:[%s4230_s3] sm:$0x3] }
 0x13f   :  { %1074 = vmatprep.subr.bf16.mxu0 %v3506_v47  ;;  %v4134_v47 = vsub.s32 1, %v4125_v44 }
 0x142   :  { %1075 = vmatpush1.bf16.msra.mxu0 %v3504_v48  ;;  %v319_v48 = vrot.slane %v314_v46, %v4128_v45 }
 0x143   :  { %1076 = vmatprep.subr.bf16.mxu0 %v3509_v49 }
 0x146   :  { %1077 = vmatpush1.bf16.msra.mxu0 %v3507_v50  ;;  %v323_v50 = vrot.slane %v314_v46, %v4134_v47 }
 0x147   :  { %1078 = vmatprep.subr.bf16.mxu0 %v3512_v51 }
 0x14a   :  { %1079 = vmatpush1.bf16.msra.mxu0 %v3510_v52 }
 0x14b   :  { %1080 = vmatprep.subr.bf16.mxu0 %v3515_v53 }
 0x14e   :  { %1081 = vmatpush1.bf16.msra.mxu0 %v3513_v54 }
 0x14f   :  { %1082 = vmatprep.subr.bf16.mxu0 %v3518_v55 }
 0x152   :  { %1083 = vmatpush1.bf16.msra.mxu0 %v3516_v56 }
 0x153   :  { %1095 = vmatprep.subr.bf16.mxu0 %v3521_v59 }
 0x155   :  { %1085 = vmatmul.mubr.bf16.vlgmr.msra.gmra.mrb[0].mxu0 %v182_v62  ;;  %v1331_v62 = vld [vmem:[#allocation10 + $0x18] sm:$0xff] }
 0x156   :  { %1096 = vmatpush1.bf16.msra.mxu0 %v3519_v63  ;;  %1127 = vmatprep.mubr.bf16.mxu0 %v185_v0 }
 0x157   :  { %1097 = vmatprep.subr.bf16.mxu0 %v3524_v1  ;;  %v3280_v1 = vpack.c.bf16 %v1331_v62, %v1330_v61  ;;  %v1462_v62 = vld [vmem:[#allocation11 + $0x68] sm:$0xff] }
 0x15a   :  { %1098 = vmatpush1.bf16.msra.mxu0 %v3522_v2 }
 0x15b   :  { %1099 = vmatprep.subr.bf16.mxu0 %v3527_v3  ;;  %v1332_v3 = vld [vmem:[#allocation10 + $0x20] sm:$0xff] }
 0x15e   :  { %1100 = vmatpush1.bf16.msra.mxu0 %v3525_v4  ;;  %v1333_v4 = vld [vmem:[#allocation10 + $0x28] sm:$0xff] }
 0x15f   :  { %1101 = vmatprep.subr.bf16.mxu0 %v3530_v5  ;;  %v3284_v5 = vpack.c.bf16 %v1333_v4, %v1332_v3  ;;  %v3585_v4 = vld [vmem:[#allocation13 + $0x4] ss:$8 sps:$4 sm:$0xff]  }
 0x162   :  { %1102 = vmatpush1.bf16.msra.mxu0 %v3528_v6  ;;  %v1334_v6 = vld [vmem:[#allocation10 + $0x30] sm:$0xff] }
 0x163   :  { %1103 = vmatprep.subr.bf16.mxu0 %v3533_v7  ;;  %v1335_v7 = vld [vmem:[#allocation10 + $0x38] sm:$0xff] }
 0x166   :  { %1104 = vmatpush1.bf16.msra.mxu0 %v3531_v8  ;;  %v3288_v8 = vpack.c.bf16 %v1335_v7, %v1334_v6 }
 0x167   :  { %1105 = vmatprep.subr.bf16.mxu0 %v3536_v9  ;;  %v1336_v9 = vld [vmem:[#allocation10 + $0x40] sm:$0xff] }
 0x16a   :  { %1106 = vmatpush1.bf16.msra.mxu0 %v3534_v10  ;;  %v1337_v10 = vld [vmem:[#allocation10 + $0x48] sm:$0xff] }
 0x16b   :  { %1107 = vmatprep.subr.bf16.mxu0 %v3539_v11  ;;  %v3292_v11 = vpack.c.bf16 %v1337_v10, %v1336_v9 }
 0x16e   :  { %1108 = vmatpush1.bf16.msra.mxu0 %v3537_v12  ;;  %v1338_v12 = vld [vmem:[#allocation10 + $0x50] sm:$0xff] }
 0x16f   :  { %1109 = vmatprep.subr.bf16.mxu0 %v3542_v13  ;;  %v1339_v13 = vld [vmem:[#allocation10 + $0x58] sm:$0xff] }
 0x172   :  { %1110 = vmatpush1.bf16.msra.mxu0 %v3540_v14  ;;  %v3296_v14 = vpack.c.bf16 %v1339_v13, %v1338_v12 }
 0x173   :  { %1111 = vmatprep.subr.bf16.mxu0 %v3545_v15  ;;  %v1340_v15 = vld [vmem:[#allocation10 + $0x60] sm:$0xff] }
 0x176   :  { %1112 = vmatpush1.bf16.msra.mxu0 %v3543_v16  ;;  %v1341_v16 = vld [vmem:[#allocation10 + $0x68] sm:$0xff] }
 0x177   :  { %1113 = vmatprep.subr.bf16.mxu0 %v3548_v17  ;;  %v3300_v17 = vpack.c.bf16 %v1341_v16, %v1340_v15 }
 0x17a   :  { %1114 = vmatpush1.bf16.msra.mxu0 %v3546_v18  ;;  %v1342_v18 = vld [vmem:[#allocation10 + $0x70] sm:$0xff] }
 0x17b   :  { %1115 = vmatprep.subr.bf16.mxu0 %v3551_v19  ;;  %v1343_v19 = vld [vmem:[#allocation10 + $0x78] sm:$0xff] }
 0x17e   :  { %1116 = vmatpush1.bf16.msra.mxu0 %v3549_v20  ;;  %v3304_v20 = vpack.c.bf16 %v1343_v19, %v1342_v18 }
 0x17f   :  { %1117 = vmatprep.subr.bf16.mxu0 %v3554_v21 }
 0x182   :  { %1118 = vmatpush1.bf16.msra.mxu0 %v3552_v22 }
 0x183   :  { %1119 = vmatprep.subr.bf16.mxu0 %v3557_v23 }
 0x186   :  { %1120 = vmatpush1.bf16.msra.mxu0 %v3555_v24 }
 0x187   :  { %1121 = vmatprep.subr.bf16.mxu0 %v3560_v25  ;;  %v2969_v25 = vld [vmem:[%s4232_s5] ss:$0 sm:$0xff] }
 0x18a   :  { %1122 = vmatpush1.bf16.msra.mxu0 %v3558_v26 }
 0x18b   :  { %1123 = vmatprep.subr.bf16.mxu0 %v3563_v27 }
 0x18e   :  { %1124 = vmatpush1.bf16.msra.mxu0 %v3561_v28 }
 0x18f   :  { %1125 = vmatprep.subr.bf16.mxu0 %v3566_v29 }
 0x192   :  { %1126 = vmatpush1.bf16.msra.mxu0 %v3564_v30 }
 0x195   :  { %1128 = vmatmul.mubr.bf16.vlgmr.msra.gmra.mrb[0].mxu0 %v184_v33 }
 0x268   :  { %v1129_v49 = vpop.f32.mrb[0].mxu0 }
 0x269   :  { %v1131_v51 = vpop.f32.mrb[1].mxu0  ;;  %v3340_v53 = vadd.f32 %v1129_v49, %v319_v48  ;;  %v1456_v49 = vld [vmem:[#allocation11 + $0x38] sm:$0xff] }
 0x26a   :  { %v1133_v52 = vpop.f32.mrb[2].mxu0  ;;  %v3341_v56 = vadd.f32 %v1131_v51, %v323_v50  ;;  %v1457_v51 = vld [vmem:[#allocation11 + $0x40] sm:$0xff] }
 0x26b   :  { %v3342_v54 = vadd.f32 %v1133_v52, %v319_v48  ;;  %v1135_v55 = vpop.f32.mrb[3].mxu0  ;;  %v1455_v48 = vld [vmem:[#allocation11 + $0x30] sm:$0xff]  ;;  %v1458_v52 = vld [vmem:[#allocation11 + $0x48] sm:$0xff] }
 0x26c   :  { %v3343_v57 = vadd.f32 %v1135_v55, %v323_v50  ;;  %v3320_v50 = vpack.c.bf16 %v1456_v49, %v1455_v48  ;;  %v1720_v49 = vld [vmem:[#allocation14 + $0x50] sm:$0xff] }
 0x26d   :  { %v1138_v58 = vpack.c.bf16 %v3342_v54, %v3340_v53  ;;  %v3324_v53 = vpack.c.bf16 %v1458_v52, %v1457_v51  ;;  %v2986_v54 = vld [vmem:[%s4234_s7] ss:$0 sm:$0xff] }
 0x26e   :  { %v1139_v59 = vpack.c.bf16 %v3343_v57, %v3341_v56  ;;  %v1459_v56 = vld [vmem:[#allocation11 + $0x50] sm:$0xff]  ;;  %v1460_v57 = vld [vmem:[#allocation11 + $0x58] sm:$0xff] }
 0x26f   :  { %v1142_v60 = vmul.bf16 1045249613, %v1138_v58  ;;  %vm1140_vm1 = vcmp.gt.bf16.partialorder %v1138_v58, 0  ;;  %v3328_v61 = vpack.c.bf16 %v1460_v57, %v1459_v56  ;;  %v1736_v57 = vld [vmem:[#allocation14 + $0xd0] sm:$0xff] }
 0x270   :  { %vm1141_vm0 = vcmp.gt.bf16.partialorder %v1139_v59, 0  ;;  %v1143_v63 = vmul.bf16 1045249613, %v1139_v59 }
 0x271   :  { %v1144_v2 = vsel %vm1140_vm1, %v1138_v58, %v1142_v60  ;;  %v1461_v58 = vld [vmem:[#allocation11 + $0x60] sm:$0xff] }
 0x272   :  { %v1145_v0 = vsel %vm1141_vm0, %v1139_v59, %v1143_v63 }
 0x273   :  { %1313 = vmatprep.mubr.bf16.mxu1 %v1145_v0  ;;  %v3332_v0 = vpack.c.bf16 %v1462_v62, %v1461_v58  ;;  %v1740_v58 = vld [vmem:[#allocation14 + $0xf0] sm:$0xff] }
 0x274   :  { %1314 = vmatmul.mubr.bf16.vlgmr.msra.gmra.mrb[0].mxu1 %v1144_v2  ;;  %v1464_v2 = vld [vmem:[#allocation11 + $0x78] sm:$0xff]  ;;  %v1748_v62 = vld [vmem:[#allocation14 + $0x130] sm:$0xff] }
 0x275   :  { %3279 = vmatpush3.bf16.msra.mxu1 %v3276_v42  ;;  %v1454_v42 = vld [vmem:[#allocation11 + $0x28] sm:$0xff] }
 0x276   :  { %3281 = vmatprep.subr.bf16.mxu1 %v3280_v1  ;;  %v3316_v46 = vpack.c.bf16 %v1454_v42, %v1453_v41  ;;  %v1712_v41 = vld [vmem:[#allocation14 + $0x10] sm:$0xff] }
 0x277   :  { %v1716_v42 = vld [vmem:[#allocation14 + $0x30] sm:$0xff] }
 0x278   :  { %v3009_v48 = vcombine.high %v1712_v41, %v1716_v42 }
 0x279   :  { %3283 = vmatpush3.bf16.msra.mxu1 %v3280_v1  ;;  %v1463_v1 = vld [vmem:[#allocation11 + $0x70] sm:$0xff] }
 0x27a   :  { %3285 = vmatprep.subr.bf16.mxu1 %v3284_v5  ;;  %v3336_v3 = vpack.c.bf16 %v1464_v2, %v1463_v1  ;;  %2606 = vmatprep.subr.bf16.mxu0 %v3009_v48  ;;  %v1752_v1 = vld [vmem:[#allocation14 + $0x150] sm:$0xff] }
 0x27b   :  { %v1756_v2 = vld [vmem:[#allocation14 + $0x170] sm:$0xff] }
 0x27d   :  { %3287 = vmatpush3.bf16.msra.mxu1 %v3284_v5  ;;  %v1433_v5 = vand.u32 127, %v316_v43  ;;  %v3583_v43 = vld [vmem:[#allocation13] ss:$8 sps:$4 sm:$0xff]  }
 0x27e   :  { %3289 = vmatprep.subr.bf16.mxu1 %v3288_v8 }
 0x27f   :  { %vm1434_vm3 = vcmp.lt.s32.totalorder %v1433_v5, 32  ;;  %v1760_v5 = vld [vmem:[#allocation14 + $0x190] sm:$0xff] }
 0x281   :  { %3291 = vmatpush3.bf16.msra.mxu1 %v3288_v8 }
 0x282   :  { %3293 = vmatprep.subr.bf16.mxu1 %v3292_v11 }
 0x285   :  { %3295 = vmatpush3.bf16.msra.mxu1 %v3292_v11 }
 0x286   :  { %3297 = vmatprep.subr.bf16.mxu1 %v3296_v14 }
 0x289   :  { %3299 = vmatpush3.bf16.msra.mxu1 %v3296_v14  ;;  %v1437_v14 = vld [vmem:[#allocation5] sm:$0xff] }
 0x28a   :  { %3301 = vmatprep.subr.bf16.mxu1 %v3300_v17 }
 0x28d   :  { %3303 = vmatpush3.bf16.msra.mxu1 %v3300_v17  ;;  %v1438_v17 = vld [vmem:[#allocation5 + $0x8] sm:$0xff] }
 0x28e   :  { %3305 = vmatprep.subr.bf16.mxu1 %v3304_v20 }
 0x291   :  { %3307 = vmatpush3.bf16.msra.mxu1 %v3304_v20 }
 0x292   :  { %3309 = vmatprep.subr.bf16.mxu1 %v3308_v38 }
 0x347   :  { %v3164_v21 = vpop.f32.mrb[0].mxu1 }
 0x348   :  { %v3165_v22 = vpop.f32.mrb[1].mxu1 }
 0x349   :  { %v3166_v23 = vadd.f32 %v3165_v22, %v3164_v21  ;;  %v3167_v24 = vpop.f32.mrb[2].mxu1  ;;  %v3588_v22 = vld [vmem:[#allocation13 + $0x14] ss:$8 sps:$4 sm:$0xff]  }
 0x34a   :  { %v3168_v26 = vpop.f32.mrb[3].mxu1 }
 0x34b   :  { %v3169_v27 = vadd.f32 %v3168_v26, %v3167_v24  ;;  %v1316_v28 = vadd.f32 %v3166_v23, %v2969_v25  ;;  %v3586_v23 = vld [vmem:[#allocation13 + $0x10] ss:$8 sps:$4 sm:$0xff]   ;;  %v3591_v24 = vld [vmem:[#allocation13 + $0x24] ss:$8 sps:$4 sm:$0xff]   ;;  %v3594_v26 = vld [vmem:[#allocation13 + $0x34] ss:$8 sps:$4 sm:$0xff]  }
 0x34d   :  { %v1319_v29 = vadd.f32 %v3169_v27, %v2969_v25  ;;  %v3589_v25 = vld [vmem:[#allocation13 + $0x20] ss:$8 sps:$4 sm:$0xff]   ;;  %v3592_v27 = vld [vmem:[#allocation13 + $0x30] ss:$8 sps:$4 sm:$0xff]  }
 0x34f   :  { %v1322_v30 = vpack.c.bf16 %v1319_v29, %v1316_v28  ;;  %v3597_v28 = vld [vmem:[#allocation13 + $0x44] ss:$8 sps:$4 sm:$0xff]   ;;  %v3595_v29 = vld [vmem:[#allocation13 + $0x40] ss:$8 sps:$4 sm:$0xff]  }
 0x351   :  { %v1324_v31 = vmul.bf16 1045249613, %v1322_v30  ;;  %vm1323_vm2 = vcmp.gt.bf16.partialorder %v1322_v30, 0 }
 0x353   :  { %v1325_v32 = vsel %vm1323_vm2, %v1322_v30, %v1324_v31  ;;  %v3600_v30 = vld [vmem:[#allocation13 + $0x54] ss:$8 sps:$4 sm:$0xff]   ;;  %v3598_v31 = vld [vmem:[#allocation13 + $0x50] ss:$8 sps:$4 sm:$0xff]  }
 0x354   :  { %v1326_v33 = vunpack.c.l.bf16 %v1325_v32  ;;  %v1327_v34 = vunpack.c.h.bf16 %v1325_v32  ;;  %v3603_v32 = vld [vmem:[#allocation13 + $0x64] ss:$8 sps:$4 sm:$0xff]  }
 0x356   :  { %3238 = vmatprep.mubr.f32.mxu1 %v1326_v33  ;;  %v3601_v33 = vld [vmem:[#allocation13 + $0x60] ss:$8 sps:$4 sm:$0xff]  }
 0x357   :  { %3239 = vmatmul.mubr.f32.vlgmr.msra.gmra.mrb[4].mxu1 %v1327_v34  ;;  %v3606_v34 = vld [vmem:[#allocation13 + $0x74] ss:$8 sps:$4 sm:$0xff]  }
 0x358   :  { %3311 = vmatpush3.bf16.msra.mxu1 %v3308_v38  ;;  %v4147_v38 = vld [vmem:[#allocation14 + $0x20] sm:$0xff] }
 0x359   :  { %3313 = vmatprep.subr.bf16.mxu1 %v3312_v40  ;;  %v3004_v39 = vcombine.low %v4145_v37, %v4147_v38 }
 0x35c   :  { %3315 = vmatpush3.bf16.msra.mxu1 %v3312_v40  ;;  %v3005_v40 = vcombine.high %v4145_v37, %v4147_v38 }
 0x35d   :  { %3317 = vmatprep.subr.bf16.mxu1 %v3316_v46 }
 0x360   :  { %3319 = vmatpush3.bf16.msra.mxu1 %v3316_v46  ;;  %v3008_v46 = vcombine.low %v1712_v41, %v1716_v42  ;;  %v1718_v41 = vld [vmem:[#allocation14 + $0x40] sm:$0xff] }
 0x361   :  { %3321 = vmatprep.subr.bf16.mxu1 %v3320_v50  ;;  %v1722_v42 = vld [vmem:[#allocation14 + $0x60] sm:$0xff] }
 0x362   :  { %2607 = vmatpush1.bf16.msra.mxu0 %v3008_v46  ;;  %v3013_v48 = vcombine.high %v1718_v41, %v1722_v42 }
 0x364   :  { %3323 = vmatpush3.bf16.msra.mxu1 %v3320_v50  ;;  %v1724_v50 = vld [vmem:[#allocation14 + $0x70] sm:$0xff] }
 0x365   :  { %3325 = vmatprep.subr.bf16.mxu1 %v3324_v53  ;;  %v3016_v51 = vcombine.low %v1720_v49, %v1724_v50  ;;  %v3017_v52 = vcombine.high %v1720_v49, %v1724_v50  ;;  %v1726_v50 = vld [vmem:[#allocation14 + $0x80] sm:$0xff] }
 0x367   :  { %2608 = vmatprep.subr.bf16.mxu0 %v3017_v52  ;;  %v3012_v52 = vcombine.low %v1718_v41, %v1722_v42  ;;  %v1824_v41 = vld [vmem:[#allocation14 + $0x390] sm:$0xff] }
 0x368   :  { %3327 = vmatpush3.bf16.msra.mxu1 %v3324_v53  ;;  %2609 = vmatpush1.bf16.msra.mxu0 %v3016_v51  ;;  %v1728_v53 = vld [vmem:[#allocation14 + $0x90] sm:$0xff]  ;;  %v1730_v51 = vld [vmem:[#allocation14 + $0xa0] sm:$0xff] }
 0x369   :  { %3329 = vmatprep.subr.bf16.mxu1 %v3328_v61  ;;  %v1828_v42 = vld [vmem:[#allocation14 + $0x3b0] sm:$0xff] }
 0x36c   :  { %3331 = vmatpush3.bf16.msra.mxu1 %v3328_v61  ;;  %v1744_v61 = vld [vmem:[#allocation14 + $0x110] sm:$0xff] }
 0x36d   :  { %3333 = vmatprep.subr.bf16.mxu1 %v3332_v0 }
 0x370   :  { %3335 = vmatpush3.bf16.msra.mxu1 %v3332_v0  ;;  %v3041_v0 = vcombine.high %v1744_v61, %v1748_v62 }
 0x371   :  { %3337 = vmatprep.subr.bf16.mxu1 %v3336_v3 }
 0x374   :  { %3339 = vmatpush3.bf16.msra.mxu1 %v3336_v3  ;;  %v3048_v3 = vcombine.low %v1752_v1, %v1756_v2 }
 0x375   :  { %1659 = vmatprep.subr.bf16.mxu1 %v3585_v4  ;;  %v3049_v4 = vcombine.high %v1752_v1, %v1756_v2 }
 0x42a   :  { %v3240_v55 = vpop.f32.mrb[4].mxu1 }
 0x42b   :  { %v1423_v59 = vadd.f32 %v3240_v55, %v2986_v54  ;;  %v1417_v60 = vpop.f32.mrb[5].mxu1 }
 0x42c   :  { %v1418_v63 = vadd.f32 %v2986_v54, %v1417_v60  ;;  %v1732_v54 = vld [vmem:[#allocation14 + $0xb0] sm:$0xff]  ;;  %v3033_v60 = vcombine.high %v1736_v57, %v1740_v58 }
 0x42d   :  { %1427 = vst [vmem:[#allocation17 + $0x8] sm:$0xff] %v1423_v59  ;;  %v3024_v55 = vcombine.low %v1728_v53, %v1732_v54  ;;  %v3025_v56 = vcombine.high %v1728_v53, %v1732_v54  ;;  %v3021_v53 = vcombine.high %v1726_v50, %v1730_v51  ;;  %v1734_v54 = vld [vmem:[#allocation14 + $0xc0] sm:$0xff] }
 0x42e   :  { %1426 = vst [vmem:[#allocation17] sm:$0xff] %v1418_v63  ;;  %1428 = vrot.lane.b32.xlu0 %v1418_v63, %s3924_s16 }
 0x42f   :  { %2610 = vmatprep.subr.bf16.mxu0 %v3025_v56  ;;  %v3020_v56 = vcombine.low %v1726_v50, %v1730_v51  ;;  %v1830_v50 = vld [vmem:[#allocation14 + $0x3c0] sm:$0xff] }
 0x430   :  { %2611 = vmatpush1.bf16.msra.mxu0 %v3024_v55  ;;  %v1738_v55 = vld [vmem:[#allocation14 + $0xe0] sm:$0xff] }
 0x431   :  { %2612 = vmatprep.subr.bf16.mxu0 %v3033_v60  ;;  %v3028_v60 = vcombine.low %v1734_v54, %v1738_v55  ;;  %v1834_v51 = vld [vmem:[#allocation14 + $0x3e0] sm:$0xff] }
 0x432   :  { %1430 = vrot.lane.b32.xlu0 %v1423_v59, %s3924_s16 }
 0x4a0   :  { %v1429_v6 = vpop.permute.xlu0 %1428 }
 0x4a1   :  { %v1435_v7 = vsel %vm1434_vm3, %v1429_v6, 0.0  ;;  %v1764_v6 = vld [vmem:[#allocation14 + $0x1b0] sm:$0xff] }
 0x4a2   :  { %v1439_v8 = vmul.f32 0.5, %v1435_v7  ;;  %v3056_v7 = vcombine.low %v1760_v5, %v1764_v6 }
 0x4a4   :  { %v1441_v9 = vmul.f32 1.442695, %v1439_v8  ;;  %v1431_v10 = vpop.permute.xlu0 %1430  ;;  %v3057_v8 = vcombine.high %v1760_v5, %v1764_v6 }
 0x4a5   :  { %v1436_v11 = vsel %vm1434_vm3, %v1431_v10, 0.0  ;;  %v1772_v10 = vld [vmem:[#allocation14 + $0x1f0] sm:$0xff] }
 0x4a6   :  { %3607 = vpow2.f32 %v1441_v9  ;;  %v1440_v12 = vmul.f32 0.5, %v1436_v11  ;;  %v1768_v9 = vld [vmem:[#allocation14 + $0x1d0] sm:$0xff] }
 0x4a7   :  { %v3064_v11 = vcombine.low %v1768_v9, %v1772_v10 }
 0x4a8   :  { %v1443_v13 = vmul.f32 1.442695, %v1440_v12  ;;  %v3065_v12 = vcombine.high %v1768_v9, %v1772_v10 }
 0x4aa   :  { %3609 = vpow2.f32 %v1443_v13  ;;  %v1776_v13 = vld [vmem:[#allocation14 + $0x210] sm:$0xff] }
 0x4b0   :  { %v3608_v15 = vpop.eup %3607 }
 0x4b1   :  { %v1445_v16 = vmul.f32 %v3608_v15, %v1437_v14  ;;  %v1780_v14 = vld [vmem:[#allocation14 + $0x230] sm:$0xff] }
 0x4b2   :  { %v3072_v15 = vcombine.low %v1776_v13, %v1780_v14 }
 0x4b3   :  { %v1447_v18 = vadd.f32 %v1445_v16, %v1418_v63  ;;  %v3040_v63 = vcombine.low %v1744_v61, %v1748_v62  ;;  %v3073_v16 = vcombine.high %v1776_v13, %v1780_v14  ;;  %v1750_v62 = vld [vmem:[#allocation14 + $0x140] sm:$0xff] }
 0x4b4   :  { %v3610_v19 = vpop.eup %3609 }
 0x4b5   :  { %3273 = vmatprep.mubr.f32.mxu1 %v1447_v18  ;;  %v1446_v20 = vmul.f32 %v3610_v19, %v1438_v17  ;;  %v1784_v17 = vld [vmem:[#allocation14 + $0x250] sm:$0xff] }
 0x4b6   :  { %v1788_v18 = vld [vmem:[#allocation14 + $0x270] sm:$0xff] }
 0x4b7   :  { %v1448_v21 = vadd.f32 %v1446_v20, %v1423_v59  ;;  %v3032_v59 = vcombine.low %v1736_v57, %v1740_v58  ;;  %v3080_v19 = vcombine.low %v1784_v17, %v1788_v18  ;;  %v3081_v20 = vcombine.high %v1784_v17, %v1788_v18  ;;  %v1742_v58 = vld [vmem:[#allocation14 + $0x100] sm:$0xff] }
 0x4b8   :  { %v3029_v57 = vcombine.high %v1734_v54, %v1738_v55  ;;  %v1836_v54 = vld [vmem:[#allocation14 + $0x3f0] sm:$0xff]  ;;  %v3124_v55 = vcombine.low %v1830_v50, %v1834_v51 }
 0x4b9   :  { %3274 = vmatmul.mubr.f32.vlgmr.msra.gmra.mrb[6].mxu1 %v1448_v21  ;;  %2613 = vmatpush1.bf16.msra.mxu0 %v3032_v59  ;;  %v1796_v21 = vld [vmem:[#allocation14 + $0x2b0] sm:$0xff]  ;;  %v1746_v59 = vld [vmem:[#allocation14 + $0x120] sm:$0xff] }
 0x4ba   :  { %1660 = vmatpush1.bf16.msra.mxu1 %v3583_v43  ;;  %1691 = vmatprep.mubr.bf16.mxu1 %v3925_v36  ;;  %v1792_v43 = vld [vmem:[#allocation14 + $0x290] sm:$0xff]  ;;  %v3037_v61 = vcombine.high %v1742_v58, %v1746_v59  ;;  %v3036_v37 = vcombine.low %v1742_v58, %v1746_v59  ;;  %v1711_v58 = vld [vmem:[#allocation14 + $0x8] sm:$0xff] }
 0x4bb   :  { %1661 = vmatprep.subr.bf16.mxu1 %v3588_v22  ;;  %2614 = vmatprep.subr.bf16.mxu0 %v3041_v0  ;;  %v3088_v22 = vcombine.low %v1792_v43, %v1796_v21  ;;  %v1762_v0 = vld [vmem:[#allocation14 + $0x1a0] sm:$0xff]  ;;  %v1715_v59 = vld [vmem:[#allocation14 + $0x28] sm:$0xff] }
 0x4bd   :  { %2615 = vmatpush1.bf16.msra.mxu0 %v3040_v63  ;;  %v1754_v63 = vld [vmem:[#allocation14 + $0x160] sm:$0xff] }
 0x4be   :  { %1662 = vmatpush1.bf16.msra.mxu1 %v3586_v23  ;;  %2616 = vmatprep.subr.bf16.mxu0 %v3049_v4  ;;  %v3089_v23 = vcombine.high %v1792_v43, %v1796_v21  ;;  %v3045_v38 = vcombine.high %v1750_v62, %v1754_v63  ;;  %v3044_v1 = vcombine.low %v1750_v62, %v1754_v63  ;;  %v1770_v4 = vld [vmem:[#allocation14 + $0x1e0] sm:$0xff]  ;;  %v1567_v62 = vld [vmem:[%s4238_s11] sm:$0x3] }
 0x4bf   :  { %1663 = vmatprep.subr.bf16.mxu1 %v3591_v24  ;;  %v1800_v24 = vld [vmem:[#allocation14 + $0x2d0] sm:$0xff]  ;;  %v1572_v63 = vrot.slane %v1567_v62, %v4128_v45 }
 0x4c1   :  { %2617 = vmatpush1.bf16.msra.mxu0 %v3048_v3  ;;  %v1766_v3 = vld [vmem:[#allocation14 + $0x1c0] sm:$0xff] }
 0x4c2   :  { %1664 = vmatpush1.bf16.msra.mxu1 %v3589_v25  ;;  %2618 = vmatprep.subr.bf16.mxu0 %v3057_v8  ;;  %v1804_v25 = vld [vmem:[#allocation14 + $0x2f0] sm:$0xff]  ;;  %v3061_v6 = vcombine.high %v1766_v3, %v1770_v4  ;;  %v1778_v8 = vld [vmem:[#allocation14 + $0x220] sm:$0xff]  ;;  %v3060_v9 = vcombine.low %v1766_v3, %v1770_v4 }
 0x4c3   :  { %1665 = vmatprep.subr.bf16.mxu1 %v3594_v26  ;;  %v3096_v26 = vcombine.low %v1800_v24, %v1804_v25 }
 0x4c5   :  { %2619 = vmatpush1.bf16.msra.mxu0 %v3056_v7  ;;  %v1774_v7 = vld [vmem:[#allocation14 + $0x200] sm:$0xff] }
 0x4c6   :  { %1666 = vmatpush1.bf16.msra.mxu1 %v3592_v27  ;;  %2620 = vmatprep.subr.bf16.mxu0 %v3065_v12  ;;  %v3097_v27 = vcombine.high %v1800_v24, %v1804_v25  ;;  %v3069_v10 = vcombine.high %v1774_v7, %v1778_v8  ;;  %v1786_v12 = vld [vmem:[#allocation14 + $0x260] sm:$0xff]  ;;  %v3068_v13 = vcombine.low %v1774_v7, %v1778_v8 }
 0x4c7   :  { %1667 = vmatprep.subr.bf16.mxu1 %v3597_v28  ;;  %v1808_v28 = vld [vmem:[#allocation14 + $0x310] sm:$0xff] }
 0x4c9   :  { %2621 = vmatpush1.bf16.msra.mxu0 %v3064_v11  ;;  %v1782_v11 = vld [vmem:[#allocation14 + $0x240] sm:$0xff] }
 0x4ca   :  { %1668 = vmatpush1.bf16.msra.mxu1 %v3595_v29  ;;  %2622 = vmatprep.subr.bf16.mxu0 %v3073_v16  ;;  %v1812_v29 = vld [vmem:[#allocation14 + $0x330] sm:$0xff]  ;;  %v3077_v14 = vcombine.high %v1782_v11, %v1786_v12  ;;  %v1794_v16 = vld [vmem:[#allocation14 + $0x2a0] sm:$0xff]  ;;  %v3076_v17 = vcombine.low %v1782_v11, %v1786_v12 }
 0x4cb   :  { %1669 = vmatprep.subr.bf16.mxu1 %v3600_v30  ;;  %v3104_v30 = vcombine.low %v1808_v28, %v1812_v29 }
 0x4cd   :  { %2623 = vmatpush1.bf16.msra.mxu0 %v3072_v15  ;;  %v1790_v15 = vld [vmem:[#allocation14 + $0x280] sm:$0xff] }
 0x4ce   :  { %1670 = vmatpush1.bf16.msra.mxu1 %v3598_v31  ;;  %2624 = vmatprep.subr.bf16.mxu0 %v3081_v20  ;;  %v3105_v31 = vcombine.high %v1808_v28, %v1812_v29  ;;  %v3085_v18 = vcombine.high %v1790_v15, %v1794_v16  ;;  %v1802_v20 = vld [vmem:[#allocation14 + $0x2e0] sm:$0xff]  ;;  %v3084_v43 = vcombine.low %v1790_v15, %v1794_v16  ;;  %v1727_v15 = vld [vmem:[#allocation14 + $0x88] sm:$0xff] }
 0x4cf   :  { %1671 = vmatprep.subr.bf16.mxu1 %v3603_v32  ;;  %v2987_v32 = vld [vmem:[%s4236_s9] ss:$0 sm:$0xff]  ;;  %v1731_v16 = vld [vmem:[#allocation14 + $0xa8] sm:$0xff] }
 0x4d1   :  { %2625 = vmatpush1.bf16.msra.mxu0 %v3080_v19  ;;  %v1798_v19 = vld [vmem:[#allocation14 + $0x2c0] sm:$0xff] }
 0x4d2   :  { %1672 = vmatpush1.bf16.msra.mxu1 %v3601_v33  ;;  %2626 = vmatprep.subr.bf16.mxu0 %v3089_v23  ;;  %v3093_v21 = vcombine.high %v1798_v19, %v1802_v20  ;;  %v1810_v23 = vld [vmem:[#allocation14 + $0x320] sm:$0xff]  ;;  %v3092_v24 = vcombine.low %v1798_v19, %v1802_v20  ;;  %v1735_v19 = vld [vmem:[#allocation14 + $0xc8] sm:$0xff] }
 0x4d3   :  { %1673 = vmatprep.subr.bf16.mxu1 %v3606_v34  ;;  %v1739_v20 = vld [vmem:[#allocation14 + $0xe8] sm:$0xff] }
 0x4d5   :  { %2627 = vmatpush1.bf16.msra.mxu0 %v3088_v22  ;;  %v1806_v22 = vld [vmem:[#allocation14 + $0x300] sm:$0xff] }
 0x4d6   :  { %1674 = vmatpush1.bf16.msra.mxu1 %v3604_v35  ;;  %2628 = vmatprep.subr.bf16.mxu0 %v3097_v27  ;;  %v3101_v25 = vcombine.high %v1806_v22, %v1810_v23  ;;  %v1818_v27 = vld [vmem:[#allocation14 + $0x360] sm:$0xff]  ;;  %v3100_v28 = vcombine.low %v1806_v22, %v1810_v23  ;;  %v1743_v22 = vld [vmem:[#allocation14 + $0x108] sm:$0xff] }
 0x4d7   :  { %2520 = vmatprep.subr.bf16.mxu1 %v3005_v40  ;;  %v1747_v23 = vld [vmem:[#allocation14 + $0x128] sm:$0xff] }
 0x4d9   :  { %2629 = vmatpush1.bf16.msra.mxu0 %v3096_v26  ;;  %v1814_v26 = vld [vmem:[#allocation14 + $0x340] sm:$0xff] }
 0x4da   :  { %2630 = vmatprep.subr.bf16.mxu0 %v3105_v31  ;;  %v3109_v29 = vcombine.high %v1814_v26, %v1818_v27  ;;  %v1816_v31 = vld [vmem:[#allocation14 + $0x350] sm:$0xff] }
 0x4dd   :  { %2631 = vmatpush1.bf16.msra.mxu0 %v3104_v30  ;;  %v3108_v30 = vcombine.low %v1814_v26, %v1818_v27  ;;  %v1751_v26 = vld [vmem:[#allocation14 + $0x148] sm:$0xff] }
 0x4de   :  { %v1755_v27 = vld [vmem:[#allocation14 + $0x168] sm:$0xff] }
 0x58c   :  { %v3275_v33 = vpop.f32.mrb[6].mxu1 }
 0x58d   :  { %v1544_v34 = vadd.f32 %v3275_v33, %v2987_v32  ;;  %v1538_v35 = vpop.f32.mrb[7].mxu1 }
 0x58e   :  { %v1539_v36 = vadd.f32 %v2987_v32, %v1538_v35  ;;  %v1820_v32 = vld [vmem:[#allocation14 + $0x370] sm:$0xff]  ;;  %v1822_v35 = vld [vmem:[#allocation14 + $0x380] sm:$0xff] }
 0x58f   :  { %v3113_v33 = vcombine.high %v1816_v31, %v1820_v32 }
 0x590   :  { %v1547_v40 = vpack.c.bf16 %v1544_v34, %v1539_v36  ;;  %v3112_v34 = vcombine.low %v1816_v31, %v1820_v32  ;;  %v1826_v36 = vld [vmem:[#allocation14 + $0x3a0] sm:$0xff]  ;;  %v1763_v31 = vld [vmem:[#allocation14 + $0x1a8] sm:$0xff]  ;;  %v3046_v32 = vcombine.low %v1751_v26, %v1755_v27 }
 0x591   :  { %2632 = vmatprep.subr.bf16.mxu0 %v3113_v33 }
 0x592   :  { %v1549_v46 = vmul.bf16 1045249613, %v1547_v40  ;;  %vm1548_vm4 = vcmp.gt.bf16.partialorder %v1547_v40, 0  ;;  %2633 = vmatpush1.bf16.msra.mxu0 %v3112_v34  ;;  %v1767_v34 = vld [vmem:[#allocation14 + $0x1c8] sm:$0xff] }
 0x594   :  { %v1550_v49 = vsel %vm1548_vm4, %v1547_v40, %v1549_v46  ;;  %v3117_v40 = vcombine.high %v1822_v35, %v1826_v36  ;;  %v3116_v46 = vcombine.low %v1822_v35, %v1826_v36  ;;  %v1771_v35 = vld [vmem:[#allocation14 + $0x1e8] sm:$0xff] }
 0x595   :  { %1692 = vmatmul.mubr.bf16.vlgmr.msra.gmra.mrb[8].mxu1 %v1550_v49  ;;  %v3120_v49 = vcombine.low %v1824_v41, %v1828_v42 }
 0x596   :  { %2521 = vmatpush1.bf16.msra.mxu1 %v3004_v39  ;;  %v1758_v39 = vld [vmem:[#allocation14 + $0x180] sm:$0xff] }
 0x597   :  { %2522 = vmatprep.subr.bf16.mxu1 %v3013_v48  ;;  %v3053_v2 = vcombine.high %v1758_v39, %v1762_v0  ;;  %v3052_v5 = vcombine.low %v1758_v39, %v1762_v0  ;;  %v3121_v48 = vcombine.high %v1824_v41, %v1828_v42  ;;  %v1775_v41 = vld [vmem:[#allocation14 + $0x208] sm:$0xff] }
 0x598   :  { %v1779_v42 = vld [vmem:[#allocation14 + $0x228] sm:$0xff] }
 0x599   :  { %2634 = vmatprep.subr.bf16.mxu0 %v3121_v48  ;;  %v3071_v48 = vcombine.high %v1775_v41, %v1779_v42 }
 0x59a   :  { %2523 = vmatpush1.bf16.msra.mxu1 %v3012_v52  ;;  %2635 = vmatpush1.bf16.msra.mxu0 %v3120_v49  ;;  %v3125_v52 = vcombine.high %v1830_v50, %v1834_v51  ;;  %v1783_v49 = vld [vmem:[#allocation14 + $0x248] sm:$0xff]  ;;  %v3070_v51 = vcombine.low %v1775_v41, %v1779_v42  ;;  %v1769_v41 = vld [vmem:[#allocation14 + $0x1d8] sm:$0xff] }
 0x59b   :  { %2524 = vmatprep.subr.bf16.mxu1 %v3021_v53  ;;  %v1832_v53 = vld [vmem:[#allocation14 + $0x3d0] sm:$0xff]  ;;  %v1787_v50 = vld [vmem:[#allocation14 + $0x268] sm:$0xff]  ;;  %v1773_v42 = vld [vmem:[#allocation14 + $0x1f8] sm:$0xff] }
 0x59e   :  { %2525 = vmatpush1.bf16.msra.mxu1 %v3020_v56  ;;  %v3129_v56 = vcombine.high %v1832_v53, %v1836_v54 }
 0x59f   :  { %2526 = vmatprep.subr.bf16.mxu1 %v3029_v57  ;;  %v3128_v57 = vcombine.low %v1832_v53, %v1836_v54  ;;  %v1791_v53 = vld [vmem:[#allocation14 + $0x288] sm:$0xff] }
 0x5a0   :  { %2636 = vmatprep.subr.bf16.mxu0 %v3129_v56  ;;  %v1795_v54 = vld [vmem:[#allocation14 + $0x2a8] sm:$0xff] }
 0x5a1   :  { %2637 = vmatpush1.bf16.msra.mxu0 %v3128_v57  ;;  %v3087_v56 = vcombine.high %v1791_v53, %v1795_v54  ;;  %v1799_v57 = vld [vmem:[#allocation14 + $0x2c8] sm:$0xff] }
 0x5a2   :  { %2527 = vmatpush1.bf16.msra.mxu1 %v3028_v60  ;;  %v3007_v60 = vcombine.high %v1711_v58, %v1715_v59 }
 0x5a3   :  { %2528 = vmatprep.subr.bf16.mxu1 %v3037_v61  ;;  %v3006_v61 = vcombine.low %v1711_v58, %v1715_v59  ;;  %v1803_v58 = vld [vmem:[#allocation14 + $0x2e8] sm:$0xff]  ;;  %v3086_v59 = vcombine.low %v1791_v53, %v1795_v54  ;;  %v1785_v53 = vld [vmem:[#allocation14 + $0x258] sm:$0xff] }
 0x5a4   :  { %v1789_v54 = vld [vmem:[#allocation14 + $0x278] sm:$0xff] }
 0x5a6   :  { %2529 = vmatpush1.bf16.msra.mxu1 %v3036_v37 }
 0x5a7   :  { %2530 = vmatprep.subr.bf16.mxu1 %v3045_v38  ;;  %v1576_v38 = vrot.slane %v1567_v62, %v4134_v47  ;;  %v1811_v62 = vld [vmem:[#allocation14 + $0x328] sm:$0xff] }
 0x5aa   :  { %2531 = vmatpush1.bf16.msra.mxu1 %v3044_v1 }
 0x5ab   :  { %2532 = vmatprep.subr.bf16.mxu1 %v3053_v2 }
 0x5ae   :  { %2533 = vmatpush1.bf16.msra.mxu1 %v3052_v5 }
 0x5af   :  { %2534 = vmatprep.subr.bf16.mxu1 %v3061_v6 }
 0x5b2   :  { %2535 = vmatpush1.bf16.msra.mxu1 %v3060_v9  ;;  %v1719_v9 = vld [vmem:[#allocation14 + $0x48] sm:$0xff] }
 0x5b3   :  { %2536 = vmatprep.subr.bf16.mxu1 %v3069_v10  ;;  %v1723_v10 = vld [vmem:[#allocation14 + $0x68] sm:$0xff] }
 0x5b6   :  { %2537 = vmatpush1.bf16.msra.mxu1 %v3068_v13  ;;  %v3015_v13 = vcombine.high %v1719_v9, %v1723_v10 }
 0x5b7   :  { %2538 = vmatprep.subr.bf16.mxu1 %v3077_v14 }
 0x5ba   :  { %2539 = vmatpush1.bf16.msra.mxu1 %v3076_v17  ;;  %v3014_v17 = vcombine.low %v1719_v9, %v1723_v10  ;;  %v1713_v10 = vld [vmem:[#allocation14 + $0x18] sm:$0xff] }
 0x5bb   :  { %2540 = vmatprep.subr.bf16.mxu1 %v3085_v18  ;;  %v3023_v18 = vcombine.high %v1727_v15, %v1731_v16 }
 0x5be   :  { %2541 = vmatpush1.bf16.msra.mxu1 %v3084_v43  ;;  %v3022_v43 = vcombine.low %v1727_v15, %v1731_v16  ;;  %v1721_v16 = vld [vmem:[#allocation14 + $0x58] sm:$0xff] }
 0x5bf   :  { %2542 = vmatprep.subr.bf16.mxu1 %v3093_v21  ;;  %v3031_v21 = vcombine.high %v1735_v19, %v1739_v20 }
 0x5c2   :  { %2543 = vmatpush1.bf16.msra.mxu1 %v3092_v24  ;;  %v3030_v24 = vcombine.low %v1735_v19, %v1739_v20  ;;  %v1729_v20 = vld [vmem:[#allocation14 + $0x98] sm:$0xff] }
 0x5c3   :  { %2544 = vmatprep.subr.bf16.mxu1 %v3101_v25  ;;  %v3039_v25 = vcombine.high %v1743_v22, %v1747_v23 }
 0x5c6   :  { %2545 = vmatpush1.bf16.msra.mxu1 %v3100_v28  ;;  %v3038_v28 = vcombine.low %v1743_v22, %v1747_v23  ;;  %v1737_v23 = vld [vmem:[#allocation14 + $0xd8] sm:$0xff] }
 0x5c7   :  { %2546 = vmatprep.subr.bf16.mxu1 %v3109_v29  ;;  %v3047_v29 = vcombine.high %v1751_v26, %v1755_v27  ;;  %v1745_v27 = vld [vmem:[#allocation14 + $0x118] sm:$0xff] }
 0x5ca   :  { %2547 = vmatpush1.bf16.msra.mxu1 %v3108_v30  ;;  %v1759_v30 = vld [vmem:[#allocation14 + $0x188] sm:$0xff] }
 0x5cb   :  { %2548 = vmatprep.subr.bf16.mxu1 %v3117_v40  ;;  %v3055_v33 = vcombine.high %v1759_v30, %v1763_v31  ;;  %v3054_v36 = vcombine.low %v1759_v30, %v1763_v31  ;;  %v3063_v40 = vcombine.high %v1767_v34, %v1771_v35  ;;  %v1753_v31 = vld [vmem:[#allocation14 + $0x158] sm:$0xff] }
 0x5ce   :  { %2549 = vmatpush1.bf16.msra.mxu1 %v3116_v46  ;;  %v3062_v46 = vcombine.low %v1767_v34, %v1771_v35  ;;  %v1761_v34 = vld [vmem:[#allocation14 + $0x198] sm:$0xff] }
 0x5cf   :  { %2550 = vmatprep.subr.bf16.mxu1 %v3125_v52  ;;  %v3079_v52 = vcombine.high %v1783_v49, %v1787_v50  ;;  %v1765_v35 = vld [vmem:[#allocation14 + $0x1b8] sm:$0xff] }
 0x5d2   :  { %2551 = vmatpush1.bf16.msra.mxu1 %v3124_v55  ;;  %v3078_v55 = vcombine.low %v1783_v49, %v1787_v50  ;;  %v1777_v49 = vld [vmem:[#allocation14 + $0x218] sm:$0xff] }
 0x5d3   :  { %2563 = vmatprep.subr.bf16.mxu1 %v3007_v60  ;;  %v3095_v60 = vcombine.high %v1799_v57, %v1803_v58  ;;  %v1781_v50 = vld [vmem:[#allocation14 + $0x238] sm:$0xff] }
 0x668   :  { %v1693_v37 = vpop.f32.mrb[8].mxu1 }
 0x669   :  { %v1695_v39 = vpop.f32.mrb[9].mxu1  ;;  %v1694_v1 = vadd.f32 %v1693_v37, %v1572_v63 }
 0x66a   :  { %v1697_v0 = vpop.f32.mrb[10].mxu1  ;;  %v1696_v4 = vadd.f32 %v1695_v39, %v1576_v38  ;;  %v1819_v39 = vld [vmem:[#allocation14 + $0x368] sm:$0xff] }
 0x66b   :  { %v1698_v2 = vadd.f32 %v1697_v0, %v1572_v63  ;;  %v1699_v3 = vpop.f32.mrb[11].mxu1  ;;  %v3094_v63 = vcombine.low %v1799_v57, %v1803_v58  ;;  %v1793_v57 = vld [vmem:[#allocation14 + $0x298] sm:$0xff] }
 0x66c   :  { %v1700_v5 = vadd.f32 %v1699_v3, %v1576_v38  ;;  %v1815_v38 = vld [vmem:[#allocation14 + $0x348] sm:$0xff]  ;;  %v1797_v58 = vld [vmem:[#allocation14 + $0x2b8] sm:$0xff] }
 0x66d   :  { %v1702_v6 = vpack.c.bf16 %v1698_v2, %v1694_v1  ;;  %v3111_v1 = vcombine.high %v1815_v38, %v1819_v39  ;;  %v1823_v2 = vld [vmem:[#allocation14 + $0x388] sm:$0xff] }
 0x66e   :  { %v1703_v7 = vpack.c.bf16 %v1700_v5, %v1696_v4  ;;  %v1827_v3 = vld [vmem:[#allocation14 + $0x3a8] sm:$0xff]  ;;  %v3110_v4 = vcombine.low %v1815_v38, %v1819_v39  ;;  %v1809_v38 = vld [vmem:[#allocation14 + $0x318] sm:$0xff] }
 0x66f   :  { %v1706_v8 = vmul.bf16 1045249613, %v1702_v6  ;;  %vm1704_vm6 = vcmp.gt.bf16.partialorder %v1702_v6, 0  ;;  %v3119_v5 = vcombine.high %v1823_v2, %v1827_v3  ;;  %v1813_v39 = vld [vmem:[#allocation14 + $0x338] sm:$0xff] }
 0x670   :  { %v1707_v11 = vmul.bf16 1045249613, %v1703_v7  ;;  %vm1705_vm5 = vcmp.gt.bf16.partialorder %v1703_v7, 0 }
 0x671   :  { %v4168_v14 = vsel %vm1704_vm6, %v1702_v6, %v1706_v8  ;;  %v1831_v6 = vld [vmem:[#allocation14 + $0x3c8] sm:$0xff]  ;;  %v3118_v8 = vcombine.low %v1823_v2, %v1827_v3  ;;  %v1817_v2 = vld [vmem:[#allocation14 + $0x358] sm:$0xff] }
 0x672   :  { %v4164_v12 = vsel %vm1705_vm5, %v1703_v7, %v1707_v11  ;;  %v1835_v7 = vld [vmem:[#allocation14 + $0x3e8] sm:$0xff]  ;;  %v1717_v11 = vld [vmem:[#allocation14 + $0x38] sm:$0xff] }
 0x673   :  { %2552 = vmatprep.mubr.bf16.mxu1 %v4164_v12  ;;  %2638 = vmatprep.mubr.bf16.mxu0 %v4164_v12  ;;  %v3127_v9 = vcombine.high %v1831_v6, %v1835_v7  ;;  %v3011_v15 = vcombine.high %v1713_v10, %v1717_v11  ;;  %v1821_v3 = vld [vmem:[#allocation14 + $0x378] sm:$0xff] }
 0x674   :  { %2553 = vmatmul.mubr.bf16.vlgmr.msra.gmra.mrb[12].mxu1 %v4168_v14  ;;  %2639 = vmatmul.mubr.bf16.vlgmr.msra.gmra.mrb[4].mxu0 %v4168_v14 }
 0x675   :  { %2564 = vmatpush1.bf16.msra.mxu1 %v3006_v61  ;;  %2595 = vmatprep.mubr.bf16.mxu1 %v4164_v12  ;;  %v1807_v61 = vld [vmem:[#allocation14 + $0x308] sm:$0xff] }
 0x676   :  { %2565 = vmatprep.subr.bf16.mxu1 %v3015_v13  ;;  %v3103_v37 = vcombine.high %v1807_v61, %v1811_v62  ;;  %v3102_v0 = vcombine.low %v1807_v61, %v1811_v62  ;;  %v3126_v13 = vcombine.low %v1831_v6, %v1835_v7  ;;  %v1801_v61 = vld [vmem:[#allocation14 + $0x2d8] sm:$0xff] }
 0x677   :  { %v1805_v62 = vld [vmem:[#allocation14 + $0x2f8] sm:$0xff] }
 0x678   :  { %v1825_v6 = vld [vmem:[#allocation14 + $0x398] sm:$0xff] }
 0x679   :  { %2566 = vmatpush1.bf16.msra.mxu1 %v3014_v17  ;;  %v1725_v17 = vld [vmem:[#allocation14 + $0x78] sm:$0xff] }
 0x67a   :  { %2567 = vmatprep.subr.bf16.mxu1 %v3023_v18  ;;  %v3010_v18 = vcombine.low %v1713_v10, %v1717_v11  ;;  %v3019_v19 = vcombine.high %v1721_v16, %v1725_v17  ;;  %v1829_v7 = vld [vmem:[#allocation14 + $0x3b8] sm:$0xff] }
 0x67b   :  { %v1833_v10 = vld [vmem:[#allocation14 + $0x3d8] sm:$0xff] }
 0x67c   :  { %v1837_v11 = vld [vmem:[#allocation14 + $0x3f8] sm:$0xff] }
 0x67d   :  { %2568 = vmatpush1.bf16.msra.mxu1 %v3022_v43  ;;  %v1733_v43 = vld [vmem:[#allocation14 + $0xb8] sm:$0xff] }
 0x67e   :  { %2569 = vmatprep.subr.bf16.mxu1 %v3031_v21  ;;  %v3018_v21 = vcombine.low %v1721_v16, %v1725_v17  ;;  %v3027_v22 = vcombine.high %v1729_v20, %v1733_v43  ;;  %v3130_v16 = vcombine.low %v1833_v10, %v1837_v11  ;;  %v1858_v17 = vsub.s32 4, %v4125_v44 }
 0x681   :  { %2570 = vmatpush1.bf16.msra.mxu1 %v3030_v24  ;;  %v1741_v24 = vld [vmem:[#allocation14 + $0xf8] sm:$0xff] }
 0x682   :  { %2571 = vmatprep.subr.bf16.mxu1 %v3039_v25  ;;  %v3026_v25 = vcombine.low %v1729_v20, %v1733_v43  ;;  %v3035_v26 = vcombine.high %v1737_v23, %v1741_v24 }
 0x685   :  { %2572 = vmatpush1.bf16.msra.mxu1 %v3038_v28  ;;  %v1749_v28 = vld [vmem:[#allocation14 + $0x138] sm:$0xff] }
 0x686   :  { %2573 = vmatprep.subr.bf16.mxu1 %v3047_v29  ;;  %v3034_v29 = vcombine.low %v1737_v23, %v1741_v24  ;;  %v3043_v30 = vcombine.high %v1745_v27, %v1749_v28 }
 0x689   :  { %2574 = vmatpush1.bf16.msra.mxu1 %v3046_v32  ;;  %v1757_v32 = vld [vmem:[#allocation14 + $0x178] sm:$0xff] }
 0x68a   :  { %2575 = vmatprep.subr.bf16.mxu1 %v3055_v33  ;;  %v3042_v33 = vcombine.low %v1745_v27, %v1749_v28 }
 0x68d   :  { %2576 = vmatpush1.bf16.msra.mxu1 %v3054_v36  ;;  %v3050_v36 = vcombine.low %v1753_v31, %v1757_v32 }
 0x68e   :  { %2577 = vmatprep.subr.bf16.mxu1 %v3063_v40  ;;  %v3059_v40 = vcombine.high %v1761_v34, %v1765_v35 }
 0x691   :  { %2578 = vmatpush1.bf16.msra.mxu1 %v3062_v46  ;;  %v3058_v46 = vcombine.low %v1761_v34, %v1765_v35 }
 0x692   :  { %2579 = vmatprep.subr.bf16.mxu1 %v3071_v48  ;;  %v3067_v48 = vcombine.high %v1769_v41, %v1773_v42 }
 0x695   :  { %2580 = vmatpush1.bf16.msra.mxu1 %v3070_v51  ;;  %v3066_v51 = vcombine.low %v1769_v41, %v1773_v42 }
 0x696   :  { %2581 = vmatprep.subr.bf16.mxu1 %v3079_v52  ;;  %v3075_v52 = vcombine.high %v1777_v49, %v1781_v50 }
 0x699   :  { %2582 = vmatpush1.bf16.msra.mxu1 %v3078_v55  ;;  %v3074_v55 = vcombine.low %v1777_v49, %v1781_v50 }
 0x69a   :  { %2583 = vmatprep.subr.bf16.mxu1 %v3087_v56  ;;  %v3083_v56 = vcombine.high %v1785_v53, %v1789_v54 }
 0x69d   :  { %2584 = vmatpush1.bf16.msra.mxu1 %v3086_v59  ;;  %v3082_v59 = vcombine.low %v1785_v53, %v1789_v54 }
 0x69e   :  { %2585 = vmatprep.subr.bf16.mxu1 %v3095_v60  ;;  %v3091_v60 = vcombine.high %v1793_v57, %v1797_v58 }
 0x6a1   :  { %2586 = vmatpush1.bf16.msra.mxu1 %v3094_v63  ;;  %v3090_v63 = vcombine.low %v1793_v57, %v1797_v58 }
 0x6a2   :  { %2587 = vmatprep.subr.bf16.mxu1 %v3103_v37  ;;  %v3099_v37 = vcombine.high %v1801_v61, %v1805_v62 }
 0x6a5   :  { %2588 = vmatpush1.bf16.msra.mxu1 %v3102_v0  ;;  %v3098_v0 = vcombine.low %v1801_v61, %v1805_v62 }
 0x6a6   :  { %2589 = vmatprep.subr.bf16.mxu1 %v3111_v1  ;;  %v3107_v1 = vcombine.high %v1809_v38, %v1813_v39 }
 0x6a9   :  { %2590 = vmatpush1.bf16.msra.mxu1 %v3110_v4  ;;  %v3106_v4 = vcombine.low %v1809_v38, %v1813_v39 }
 0x6aa   :  { %2591 = vmatprep.subr.bf16.mxu1 %v3119_v5  ;;  %v3115_v5 = vcombine.high %v1817_v2, %v1821_v3 }
 0x6ad   :  { %2592 = vmatpush1.bf16.msra.mxu1 %v3118_v8  ;;  %v3114_v8 = vcombine.low %v1817_v2, %v1821_v3 }
 0x6ae   :  { %2593 = vmatprep.subr.bf16.mxu1 %v3127_v9  ;;  %v3123_v9 = vcombine.high %v1825_v6, %v1829_v7 }
 0x6b1   :  { %2594 = vmatpush1.bf16.msra.mxu1 %v3126_v13  ;;  %v3122_v13 = vcombine.low %v1825_v6, %v1829_v7 }
 0x6b2   :  { %2649 = vmatprep.subr.bf16.mxu1 %v3011_v15  ;;  %v3131_v15 = vcombine.high %v1833_v10, %v1837_v11 }
 0x6b4   :  { %2596 = vmatmul.mubr.bf16.vlgmr.msra.gmra.mrb[16].mxu1 %v4168_v14 }
 0x6b5   :  { %2650 = vmatpush1.bf16.msra.mxu1 %v3010_v18  ;;  %2681 = vmatprep.mubr.bf16.mxu1 %v4164_v12  ;;  %v3051_v12 = vcombine.high %v1753_v31, %v1757_v32  ;;  %v4180_v18 = vld [vmem:[%s4240_s13] sm:$0xff]  ;;  %s3926_s13 = smov [#allocation17]  }
 0x6b6   :  { %2651 = vmatprep.subr.bf16.mxu1 %v3019_v19  ;;  %v1862_v19 = vsub.s32 5, %v4125_v44  ;;  %v1843_v20 = vrot.slane %v4180_v18, %v4128_v45  ;;  %v1859_v43 = vrot.slane %v4180_v18, %v1858_v17  ;;  %s2821_s14 = sshll.u32 %s3926_s13, 4  ;;  %s2822_s14 = int_to_ptr.vmem [resolvable:$true] %s2821_s14 }
 0x6b7   :  { %s3851_s20 = scalar_lea.vmem %s2822_s14, 256  ;;  %p3856_p9 = scmp.lt.s32.totalorder %s2822_s14, %s2822_s14 }
 0x6b8   :  { %p3852_p8 = scmp.ne.s32.totalorder %s2822_s14, %s3851_s20  ;;  %p3857_p10 = scmp.lt.s32.totalorder %s3851_s20, %s3851_s20 }
 0x6b9   :  { %2652 = vmatpush1.bf16.msra.mxu1 %v3018_v21  ;;  %v1847_v21 = vrot.slane %v4180_v18, %v4134_v47 }
 0x6ba   :  { %2653 = vmatprep.subr.bf16.mxu1 %v3027_v22  ;;  %v1863_v22 = vrot.slane %v4180_v18, %v1862_v19  ;;  %p3858_p11 = por %p3857_p10, %p3856_p9 }
 0x6bc   :  { %p3859_p12 = pnand %p3858_p11, %p3852_p8 }
 0x6bd   :  { %2654 = vmatpush1.bf16.msra.mxu1 %v3026_v25 }
 0x6be   :  { %2655 = vmatprep.subr.bf16.mxu1 %v3035_v26 }
 0x6c1   :  { %2656 = vmatpush1.bf16.msra.mxu1 %v3034_v29 }
 0x6c2   :  { %2657 = vmatprep.subr.bf16.mxu1 %v3043_v30 }
 0x6c5   :  { %2658 = vmatpush1.bf16.msra.mxu1 %v3042_v33 }
 0x6c6   :  { %2659 = vmatprep.subr.bf16.mxu1 %v3051_v12 }
 0x6c9   :  { %2660 = vmatpush1.bf16.msra.mxu1 %v3050_v36 }
 0x6ca   :  { %2661 = vmatprep.subr.bf16.mxu1 %v3059_v40 }
 0x6cd   :  { %2662 = vmatpush1.bf16.msra.mxu1 %v3058_v46 }
 0x6ce   :  { %2663 = vmatprep.subr.bf16.mxu1 %v3067_v48 }
 0x6d1   :  { %2664 = vmatpush1.bf16.msra.mxu1 %v3066_v51 }
 0x6d2   :  { %2665 = vmatprep.subr.bf16.mxu1 %v3075_v52 }
 0x6d5   :  { %2666 = vmatpush1.bf16.msra.mxu1 %v3074_v55 }
 0x6d6   :  { %2667 = vmatprep.subr.bf16.mxu1 %v3083_v56 }
 0x6d9   :  { %2668 = vmatpush1.bf16.msra.mxu1 %v3082_v59 }
 0x6da   :  { %2669 = vmatprep.subr.bf16.mxu1 %v3091_v60 }
 0x6dd   :  { %2670 = vmatpush1.bf16.msra.mxu1 %v3090_v63 }
 0x6de   :  { %2671 = vmatprep.subr.bf16.mxu1 %v3099_v37 }
 0x6e1   :  { %2672 = vmatpush1.bf16.msra.mxu1 %v3098_v0 }
 0x6e2   :  { %2673 = vmatprep.subr.bf16.mxu1 %v3107_v1 }
 0x6e5   :  { %2674 = vmatpush1.bf16.msra.mxu1 %v3106_v4 }
 0x6e6   :  { %2675 = vmatprep.subr.bf16.mxu1 %v3115_v5 }
 0x6e9   :  { %2676 = vmatpush1.bf16.msra.mxu1 %v3114_v8 }
 0x6ea   :  { %2677 = vmatprep.subr.bf16.mxu1 %v3123_v9 }
 0x6ed   :  { %2678 = vmatpush1.bf16.msra.mxu1 %v3122_v13 }
 0x6ee   :  { %2679 = vmatprep.subr.bf16.mxu1 %v3131_v15 }
 0x6f1   :  { %2680 = vmatpush1.bf16.msra.mxu1 %v3130_v16 }
 0x6f4   :  { %2682 = vmatmul.mubr.bf16.vlgmr.msra.gmra.mrb[20].mxu1 %v4168_v14 }
 0x747   :  { %v2554_v14 = vpop.f32.mrb[12].mxu1  ;;  %v2640_v23 = vpop.f32.mrb[4].mxu0 }
 0x748   :  { %v2555_v24 = vadd.f32 %v2554_v14, %v1843_v20  ;;  %v2641_v25 = vadd.f32 %v2640_v23, %v1859_v43  ;;  %v2556_v26 = vpop.f32.mrb[13].mxu1  ;;  %v2642_v27 = vpop.f32.mrb[5].mxu0 }
 0x749   :  { %v2557_v28 = vadd.f32 %v2556_v26, %v1847_v21  ;;  %v2643_v29 = vadd.f32 %v2642_v27, %v1863_v22  ;;  %v2558_v30 = vpop.f32.mrb[14].mxu1  ;;  %v2644_v31 = vpop.f32.mrb[6].mxu0 }
 0x74a   :  { %v3132_v32 = vmul.f32 -1.442695, %v2555_v24  ;;  %v3136_v33 = vmul.f32 -1.442695, %v2641_v25  ;;  %v2559_v45 = vadd.f32 %v2558_v30, %v1843_v20  ;;  %v2645_v12 = vadd.f32 %v2644_v31, %v1859_v43  ;;  %v2560_v34 = vpop.f32.mrb[15].mxu1  ;;  %v2646_v35 = vpop.f32.mrb[7].mxu0 }
 0x74b   :  { %v3133_v36 = vmul.f32 -1.442695, %v2557_v28  ;;  %v3137_v47 = vmul.f32 -1.442695, %v2643_v29  ;;  %v2561_v40 = vadd.f32 %v2560_v34, %v1847_v21  ;;  %v2647_v41 = vadd.f32 %v2646_v35, %v1863_v22 }
 0x74c   :  { %3611 = vpow2.f32 %v3132_v32  ;;  %v3140_v42 = vmul.f32 -1.442695, %v2559_v45  ;;  %v3144_v46 = vmul.f32 -1.442695, %v2645_v12 }
 0x74d   :  { %3613 = vpow2.f32 %v3136_v33  ;;  %v3141_v48 = vmul.f32 -1.442695, %v2561_v40  ;;  %v3145_v49 = vmul.f32 -1.442695, %v2647_v41 }
 0x74e   :  { %3615 = vpow2.f32 %v3133_v36 }
 0x74f   :  { %3617 = vpow2.f32 %v3137_v47 }
 0x750   :  { %3619 = vpow2.f32 %v3140_v42 }
 0x751   :  { %3621 = vpow2.f32 %v3144_v46 }
 0x752   :  { %3623 = vpow2.f32 %v3141_v48 }
 0x753   :  { %3625 = vpow2.f32 %v3145_v49 }
 0x756   :  { %v3612_v50 = vpop.eup %3611 }
 0x757   :  { %v3614_v51 = vpop.eup %3613  ;;  %v2740_v52 = vadd.f32 1.0, %v3612_v50 }
 0x758   :  { %v3616_v53 = vpop.eup %3615  ;;  %v2744_v54 = vadd.f32 1.0, %v3614_v51 }
 0x759   :  { %v3618_v55 = vpop.eup %3617  ;;  %3627 = vrcp.f32 %v2740_v52  ;;  %v2741_v56 = vadd.f32 1.0, %v3616_v53 }
 0x75a   :  { %v3620_v57 = vpop.eup %3619  ;;  %3629 = vrcp.f32 %v2744_v54  ;;  %v2745_v58 = vadd.f32 1.0, %v3618_v55 }
 0x75b   :  { %v3622_v59 = vpop.eup %3621  ;;  %3631 = vrcp.f32 %v2741_v56  ;;  %v2748_v60 = vadd.f32 1.0, %v3620_v57 }
 0x75c   :  { %v3624_v61 = vpop.eup %3623  ;;  %3633 = vrcp.f32 %v2745_v58  ;;  %v2752_v62 = vadd.f32 1.0, %v3622_v59 }
 0x75d   :  { %v3626_v63 = vpop.eup %3625  ;;  %3635 = vrcp.f32 %v2748_v60  ;;  %v2749_v37 = vadd.f32 1.0, %v3624_v61 }
 0x75e   :  { %3637 = vrcp.f32 %v2752_v62  ;;  %v2753_v38 = vadd.f32 1.0, %v3626_v63 }
 0x75f   :  { %3639 = vrcp.f32 %v2749_v37 }
 0x760   :  { %3641 = vrcp.f32 %v2753_v38 }
 0x763   :  { %v3628_v39 = vpop.eup %3627 }
 0x764   :  { %v3630_v0 = vpop.eup %3629  ;;  %2788 = vst [vmem:[#allocation16] sm:$0xff] %v3628_v39 }
 0x765   :  { %v3632_v1 = vpop.eup %3631  ;;  %2792 = vst [vmem:[#allocation16 + $0x20] sm:$0xff] %v3630_v0 }
 0x766   :  { %v3634_v2 = vpop.eup %3633  ;;  %2789 = vst [vmem:[#allocation16 + $0x8] sm:$0xff] %v3632_v1 }
 0x767   :  { %v3636_v3 = vpop.eup %3635  ;;  %2793 = vst [vmem:[#allocation16 + $0x28] sm:$0xff] %v3634_v2 }
 0x768   :  { %v3638_v4 = vpop.eup %3637  ;;  %2796 = vst [vmem:[#allocation16 + $0x40] sm:$0xff] %v3636_v3 }
 0x769   :  { %v3640_v5 = vpop.eup %3639  ;;  %2800 = vst [vmem:[#allocation16 + $0x60] sm:$0xff] %v3638_v4 }
 0x76a   :  { %v3642_v6 = vpop.eup %3641  ;;  %2797 = vst [vmem:[#allocation16 + $0x48] sm:$0xff] %v3640_v5 }
 0x76b   :  { %2801 = vst [vmem:[#allocation16 + $0x68] sm:$0xff] %v3642_v6 }
 0x76c   :  { %3862 = shalt.err (!%p3859_p12)
}
 0x76d   :  { %s3863_s22 = scalar_lea.hbm %s4242_s15, 256 }
 0x76e   :  { %p3864_p13 = scmp.ne.s32.totalorder %s4242_s15, %s3863_s22  ;;  %p3867_p0 = scmp.lt.u32.totalorder %s3863_s22, %s4242_s15 }
 0x770   :  { %p3869_p1 = pnand %p3867_p0, %p3864_p13 }
 0x772   :  { %3872 = shalt.err (!%p3869_p1)
}
 0x773   :  { %2827 = dma.vmem_to_hbm [thread:$0]  %s2822_s14, 256, %s4242_s15, [#allocation18], %s3910_s28, %s3910_s28, %s3911_s29   ;;  %v1850_v7 = vsub.s32 2, %v4125_v44  ;;  %v1854_v8 = vsub.s32 3, %v4125_v44  ;;  %v1866_v34 = vsub.s32 6, %v4125_v44  ;;  %v1870_v35 = vsub.s32 7, %v4125_v44 }
 0x774   :  { %s3927_s15 = smov [#allocation16]  }
 0x775   :  { %v1851_v9 = vrot.slane %v4180_v18, %v1850_v7  ;;  %v1855_v10 = vrot.slane %v4180_v18, %v1854_v8  ;;  %v1867_v36 = vrot.slane %v4180_v18, %v1866_v34  ;;  %v1871_v47 = vrot.slane %v4180_v18, %v1870_v35  ;;  %s2809_s28 = sshll.u32 %s3927_s15, 4  ;;  %s2810_s28 = int_to_ptr.vmem [resolvable:$true] %s2809_s28 }
 0x776   :  { %s3873_s29 = scalar_lea.vmem %s2810_s28, 2048  ;;  %p3878_p3 = scmp.lt.s32.totalorder %s2810_s28, %s2810_s28 }
 0x777   :  { %p3874_p2 = scmp.ne.s32.totalorder %s2810_s28, %s3873_s29  ;;  %p3879_p4 = scmp.lt.s32.totalorder %s3873_s29, %s3873_s29 }
 0x779   :  { %p3880_p5 = por %p3879_p4, %p3878_p3 }
 0x77b   :  { %p3881_p6 = pnand %p3880_p5, %p3874_p2 }
 0x787   :  { %v2597_v11 = vpop.f32.mrb[16].mxu1 }
 0x788   :  { %v2598_v13 = vadd.f32 %v2597_v11, %v1851_v9  ;;  %v2599_v15 = vpop.f32.mrb[17].mxu1 }
 0x789   :  { %v2600_v16 = vadd.f32 %v2599_v15, %v1855_v10  ;;  %v2601_v17 = vpop.f32.mrb[18].mxu1 }
 0x78a   :  { %v3134_v19 = vmul.f32 -1.442695, %v2598_v13  ;;  %v2602_v20 = vadd.f32 %v2601_v17, %v1851_v9  ;;  %v2603_v43 = vpop.f32.mrb[19].mxu1 }
 0x78b   :  { %v3135_v21 = vmul.f32 -1.442695, %v2600_v16  ;;  %v2604_v22 = vadd.f32 %v2603_v43, %v1855_v10 }
 0x78c   :  { %3643 = vpow2.f32 %v3134_v19  ;;  %v3142_v14 = vmul.f32 -1.442695, %v2602_v20 }
 0x78d   :  { %3645 = vpow2.f32 %v3135_v21  ;;  %v3143_v23 = vmul.f32 -1.442695, %v2604_v22 }
 0x78e   :  { %3647 = vpow2.f32 %v3142_v14 }
 0x78f   :  { %3649 = vpow2.f32 %v3143_v23 }
 0x796   :  { %v3644_v24 = vpop.eup %3643 }
 0x797   :  { %v3646_v25 = vpop.eup %3645  ;;  %v2742_v26 = vadd.f32 1.0, %v3644_v24 }
 0x798   :  { %v3648_v27 = vpop.eup %3647  ;;  %v2743_v28 = vadd.f32 1.0, %v3646_v25 }
 0x799   :  { %v3650_v29 = vpop.eup %3649  ;;  %3651 = vrcp.f32 %v2742_v26  ;;  %v2750_v30 = vadd.f32 1.0, %v3648_v27 }
 0x79a   :  { %3653 = vrcp.f32 %v2743_v28  ;;  %v2751_v31 = vadd.f32 1.0, %v3650_v29 }
 0x79b   :  { %3655 = vrcp.f32 %v2750_v30 }
 0x79c   :  { %3657 = vrcp.f32 %v2751_v31 }
 0x7a3   :  { %v3652_v32 = vpop.eup %3651 }
 0x7a4   :  { %v3654_v33 = vpop.eup %3653  ;;  %2790 = vst [vmem:[#allocation16 + $0x10] sm:$0xff] %v3652_v32 }
 0x7a5   :  { %v3656_v45 = vpop.eup %3655  ;;  %2791 = vst [vmem:[#allocation16 + $0x18] sm:$0xff] %v3654_v33 }
 0x7a6   :  { %v3658_v12 = vpop.eup %3657  ;;  %2798 = vst [vmem:[#allocation16 + $0x50] sm:$0xff] %v3656_v45 }
 0x7a7   :  { %2799 = vst [vmem:[#allocation16 + $0x58] sm:$0xff] %v3658_v12 }
 0x7c7   :  { %v2683_v40 = vpop.f32.mrb[20].mxu1 }
 0x7c8   :  { %v2684_v41 = vadd.f32 %v2683_v40, %v1867_v36  ;;  %v2685_v42 = vpop.f32.mrb[21].mxu1 }
 0x7c9   :  { %v2686_v46 = vadd.f32 %v2685_v42, %v1871_v47  ;;  %v2687_v48 = vpop.f32.mrb[22].mxu1 }
 0x7ca   :  { %v3138_v49 = vmul.f32 -1.442695, %v2684_v41  ;;  %v2688_v50 = vadd.f32 %v2687_v48, %v1867_v36  ;;  %v2689_v51 = vpop.f32.mrb[23].mxu1 }
 0x7cb   :  { %v3139_v52 = vmul.f32 -1.442695, %v2686_v46  ;;  %v2690_v53 = vadd.f32 %v2689_v51, %v1871_v47 }
 0x7cc   :  { %3659 = vpow2.f32 %v3138_v49  ;;  %v3146_v54 = vmul.f32 -1.442695, %v2688_v50 }
 0x7cd   :  { %3661 = vpow2.f32 %v3139_v52  ;;  %v3147_v55 = vmul.f32 -1.442695, %v2690_v53 }
 0x7ce   :  { %3663 = vpow2.f32 %v3146_v54 }
 0x7cf   :  { %3665 = vpow2.f32 %v3147_v55 }
 0x7d6   :  { %v3660_v44 = vpop.eup %3659 }
 0x7d7   :  { %v3662_v56 = vpop.eup %3661  ;;  %v2746_v57 = vadd.f32 1.0, %v3660_v44 }
 0x7d8   :  { %v3664_v18 = vpop.eup %3663  ;;  %v2747_v58 = vadd.f32 1.0, %v3662_v56 }
 0x7d9   :  { %v3666_v59 = vpop.eup %3665  ;;  %3667 = vrcp.f32 %v2746_v57  ;;  %v2754_v60 = vadd.f32 1.0, %v3664_v18 }
 0x7da   :  { %3669 = vrcp.f32 %v2747_v58  ;;  %v2755_v61 = vadd.f32 1.0, %v3666_v59 }
 0x7db   :  { %3671 = vrcp.f32 %v2754_v60 }
 0x7dc   :  { %3673 = vrcp.f32 %v2755_v61 }
 0x7e3   :  { %v3668_v62 = vpop.eup %3667 }
 0x7e4   :  { %v3670_v63 = vpop.eup %3669  ;;  %2794 = vst [vmem:[#allocation16 + $0x30] sm:$0xff] %v3668_v62 }
 0x7e5   :  { %v3672_v37 = vpop.eup %3671  ;;  %2795 = vst [vmem:[#allocation16 + $0x38] sm:$0xff] %v3670_v63 }
 0x7e6   :  { %v3674_v38 = vpop.eup %3673  ;;  %2802 = vst [vmem:[#allocation16 + $0x70] sm:$0xff] %v3672_v37 }
 0x7e7   :  { %2803 = vst [vmem:[#allocation16 + $0x78] sm:$0xff] %v3674_v38 }
 0x7e8   :  { %3884 = shalt.err (!%p3881_p6)
}
 0x7e9   :  { %s4245_s0 = sld [smem:[#allocation26_spill]] }
 0x7ef   :  { %s3885_s3 = scalar_lea.hbm %s4245_s0, 2048 }
 0x7f0   :  { %p3886_p7 = scmp.ne.s32.totalorder %s4245_s0, %s3885_s3  ;;  %p3889_p8 = scmp.lt.u32.totalorder %s3885_s3, %s4245_s0 }
 0x7f2   :  { %p3891_p9 = pnand %p3889_p8, %p3886_p7 }
 0x7f4   :  { %3894 = shalt.err (!%p3891_p9)
}
 0x7f5   :  { %2815 = dma.vmem_to_hbm [thread:$0]  %s2810_s28, 2048, %s4245_s0, [#allocation4], %s3917_s8, %s3917_s8, %s3914_s19  }
 0x7f6   :  { %3905 = dma.done.wait [#allocation4], 2048  }
 0x7f7   :  { %3906 = vsyncadd [#allocation4], 4294965248 }
 0x7f8   :  { %3907 = dma.done.wait [#allocation18], 256  }
 0x7f9   :  { %3908 = vsyncadd [#allocation18], 4294967040 }
 0x7fa   :  { %2834 = vsyncpa [#allocation3], 1 }
 0x7fb   :  { %2835 = vsyncpa [#allocation6], 1 }
 0x7fc   :  { %2836 = vsyncpa [#allocation9], 1 }
 0x7fd   :  { %2837 = vsyncpa [#allocation12], 1 }
 0x7fe   :  { %2838 = vsyncpa [#allocation15], 1 }
 0x7ff   :  { %2839 = vsyncpa [#allocation4], 1 }
 0x800   :  { %2840 = vsyncpa [#allocation18], 1 }

</bundles_post_ra>
